<compile_context>
chip_gen: v7x
topology: tpu7x:2x2x1
jax: 0.10.0
libtpu: 0.0.40
codegen_flags: <defaults>
</compile_context>

<pallas_src>
import functools

import jax
import jax.numpy as jnp
from jax.experimental import pallas as pl
from jax.experimental.pallas import tpu as pltpu


def _round_up(v, m):
    return (v + m - 1) // m * m


def _gru_recurrence_kernel(gi_ref, whh_ref, bhn_ref, hs_ref, h_scr, *,
                           hp, tc, bt):
    """Serial GRU recurrence over one (batch-tile, time-chunk) block.

    gi_ref : (Bt, Tc, 3*Hp) bf16  precomputed x-projection (r/z biases folded)
    whh_ref: (Hp, 3*Hp)     bf16  W_hh^T, gate-padded to 128-lane tiles
    bhn_ref: (1, Hp)        f32   hidden bias of the n gate (kept separate)
    hs_ref : (Bt, Tc, Hp)         per-step hidden states (output)
    h_scr  : (Bt, Hp)       f32   hidden-state carry across time chunks
    """
    # First time chunk of this batch tile -> reset the carried hidden state.
    @pl.when(pl.program_id(1) == 0)
    def _():
        h_scr[...] = jnp.zeros_like(h_scr)

    h = h_scr[...]                                        # (Bt, Hp) f32 carry
    # Hoisted once per chunk: JAX does not CSE broadcast_in_dim, so leaving it
    # inside the unrolled loop would re-emit it Tc times.
    b_hn = jnp.broadcast_to(bhn_ref[...], (bt, hp))       # (Bt, Hp) f32

    # Fully-unrolled static loop over the Tc timesteps of this chunk.  Each
    # step loads its own gi row and W_hh^T directly from VMEM, so no large
    # value is pinned in vregs across the unrolled loop (avoids spills).
    for i in range(tc):
        gi = gi_ref[:, i, :].astype(jnp.float32)          # (Bt, 3Hp) bf16->f32
        # bf16 x bf16 MXU matmul, f32 accumulation; RHS streams from VMEM.
        gh = jnp.dot(h.astype(jnp.bfloat16), whh_ref[...],
                     preferred_element_type=jnp.float32)  # (Bt, 3Hp) f32
        r = jax.nn.sigmoid(gi[:, 0:hp] + gh[:, 0:hp])
        z = jax.nn.sigmoid(gi[:, hp:2 * hp] + gh[:, hp:2 * hp])
        n = jnp.tanh(gi[:, 2 * hp:] + r * (gh[:, 2 * hp:] + b_hn))
        h = n + z * (h - n)                               # == (1-z)*n + z*h
        hs_ref[:, i, :] = h.astype(hs_ref.dtype)          # lane-dense store

    h_scr[...] = h


def gru_forward(x, w_ih, w_hh, b_ih, b_hh, *, dropout_p=0.0, out_dtype=None):
    """Single-layer, unidirectional, batch_first GRU (h0 = 0).

    x: (B, T, E).  Returns (hs (B, T, H), hy (1, B, H)).
    """
    B, T, E = x.shape
    H = w_hh.shape[1]
    Hp = _round_up(H, 128)               # pad each gate to whole 128-lane tiles
    out_dtype = x.dtype if out_dtype is None else out_dtype

    # ---- gate-padded weight / bias layout (each gate occupies Hp lanes) ----
    def pad_gate_cols(w):                # (rows, 3H) -> (rows, 3Hp)
        parts = jnp.split(w, 3, axis=1)
        return jnp.concatenate(
            [jnp.pad(p, ((0, 0), (0, Hp - H))) for p in parts], axis=1)

    def pad_vec(v):                      # (H,) -> (Hp,)
        return jnp.pad(v, (0, Hp - H))

    wih_t = pad_gate_cols(w_ih.T)                                    # (E, 3Hp)
    whh_t = jnp.pad(pad_gate_cols(w_hh.T), ((0, Hp - H), (0, 0)))    # (Hp, 3Hp)
    whh_t = whh_t.astype(jnp.bfloat16)   # MXU-native bf16 operand

    b_ir, b_iz, b_in = jnp.split(b_ih, 3)
    b_hr, b_hz, b_hn = jnp.split(b_hh, 3)
    # r/z biases pre-summed; b_hn must stay separate (it is multiplied by r).
    bias_fold = jnp.concatenate(
        [pad_vec(b_ir + b_hr), pad_vec(b_iz + b_hz), pad_vec(b_in)])  # (3Hp,)
    bhn = pad_vec(b_hn).astype(jnp.float32).reshape(1, Hp)

    # ---- tiling -------------------------------------------------------------
    # Time chunk: fixed, pipeline-friendly size (<= 32, multiple of 8); T is
    # padded up to a multiple of it -- never one whole-sequence block.
    Tc = 32 if T >= 32 else _round_up(max(T, 1), 8)
    # Batch tile: time is serial, so batch is the only throughput axis.  Use
    # up to 128 MXU rows per step; prefer >= 2 tiles (so the parallel batch
    # axis can span both TensorCores on v7x) whenever B is big enough.
    MAX_BT = 128
    if B <= MAX_BT:
        Bt = B // 2 if (B % 2 == 0 and B // 2 >= 16) else B
    else:
        Bt = MAX_BT

    out_isz = jnp.dtype(out_dtype).itemsize

    def _block_bytes(bt, tc):
        gi_blk = bt * tc * 3 * Hp * 2 * 2       # bf16 gi, double-buffered
        hs_blk = bt * tc * Hp * out_isz * 2     # output block, double-buffered
        whh_blk = Hp * 3 * Hp * 2 * 2           # bf16 W_hh^T (const index, but
                                                # 2 buffers are still reserved)
        bhn_blk = Hp * 4 * 2
        scr = bt * Hp * 4                       # f32 h carry
        return gi_blk + hs_blk + whh_blk + bhn_blk + scr

    # Conservative block budget for v7x's 64 MiB physical VMEM; shrink Tc
    # first, then Bt, and set the scoped-VMEM limit explicitly below.
    VMEM_BUDGET = 40 * 1024 * 1024
    while _block_bytes(Bt, Tc) > VMEM_BUDGET and Tc > 16:
        Tc = max(16, Tc // 2)
    while _block_bytes(Bt, Tc) > VMEM_BUDGET and Bt > 8:
        Bt = max(8, _round_up(Bt // 2, 8))

    Bp = _round_up(B, Bt)
    Tp = _round_up(T, Tc)
    if (Bp, Tp) != (B, T):
        x = jnp.pad(x, ((0, Bp - B), (0, Tp - T), (0, 0)))

    # ---- hoisted, time-parallel input projection (one big MXU matmul) ------
    # Stored in bf16: halves the dominant HBM stream into the kernel; biases
    # are added in f32 before rounding.
    gi = (jnp.dot(x.reshape(Bp * Tp, E), wih_t,
                  preferred_element_type=jnp.float32)
          + bias_fold).astype(jnp.bfloat16).reshape(Bp, Tp, 3 * Hp)

    kernel = functools.partial(_gru_recurrence_kernel, hp=Hp, tc=Tc, bt=Bt)

    hs_pad = pl.pallas_call(
        kernel,
        out_shape=jax.ShapeDtypeStruct((Bp, Tp, Hp), out_dtype),
        grid_spec=pltpu.PrefetchScalarGridSpec(
            num_scalar_prefetch=0,
            grid=(Bp // Bt, Tp // Tc),
            in_specs=[
                pl.BlockSpec((Bt, Tc, 3 * Hp), lambda b, c: (b, c, 0)),  # gi
                pl.BlockSpec((Hp, 3 * Hp), lambda b, c: (0, 0)),         # W_hh^T
                pl.BlockSpec((1, Hp), lambda b, c: (0, 0)),              # b_hn
            ],
            out_specs=pl.BlockSpec((Bt, Tc, Hp), lambda b, c: (b, c, 0)),
            scratch_shapes=[pltpu.VMEM((Bt, Hp), jnp.float32)],          # h carry
        ),
        compiler_params=pltpu.CompilerParams(
            # Batch tiles independent (megacore / v7x-shardable); time is the
            # sequential carry axis.
            dimension_semantics=("parallel", "arbitrary"),
            # Explicit scoped-VMEM limit (fits within v7x's 64 MiB physical).
            vmem_limit_bytes=48 * 1024 * 1024,
        ),
    )(gi, whh_t, bhn)

    # Slice off gate/time/batch padding; hy is the state at real step T-1.
    hs = hs_pad[:B, :T, :H]
    hy = hs[:, -1, :][None]              # (1, B, H)

    # F.dropout(hs, p=0.0) is identity.
    # TODO(synk): non-zero dropout_p (training-mode Bernoulli mask) not implemented.
    return hs, hy


if __name__ == "__main__":
    # Module config: embed_size=16, hidden_size=32, n_layers=1,
    # batch_first=True, dropout=0.0, bidirectional=False.
    B, T, E, H = 2, 8, 16, 32

    key = jax.random.PRNGKey(0)
    k_x, k1, k2, k3, k4 = jax.random.split(key, 5)
    bound = 1.0 / (H ** 0.5)

    x = jax.random.normal(k_x, (B, T, E), dtype=jnp.float32)
    w_ih = jax.random.uniform(k1, (3 * H, E), jnp.float32, -bound, bound)
    w_hh = jax.random.uniform(k2, (3 * H, H), jnp.float32, -bound, bound)
    b_ih = jax.random.uniform(k3, (3 * H,), jnp.float32, -bound, bound)
    b_hh = jax.random.uniform(k4, (3 * H,), jnp.float32, -bound, bound)

    hs, hy = jax.jit(gru_forward)(x, w_ih, w_hh, b_ih, b_hh)
    jax.block_until_ready((hs, hy))

    # Pure-JAX f32 reference (same recurrence) for a sanity check.
    def ref(x, w_ih, w_hh, b_ih, b_hh):
        def step(h, x_t):
            gi = x_t @ w_ih.T + b_ih
            gh = h @ w_hh.T + b_hh
            i_r, i_z, i_n = jnp.split(gi, 3, axis=-1)
            h_r, h_z, h_n = jnp.split(gh, 3, axis=-1)
            r = jax.nn.sigmoid(i_r + h_r)
            z = jax.nn.sigmoid(i_z + h_z)
            n = jnp.tanh(i_n + r * h_n)
            h_new = (1.0 - z) * n + z * h
            return h_new, h_new
        h0 = jnp.zeros((x.shape[0], w_hh.shape[1]), x.dtype)
        h_last, hs_tm = jax.lax.scan(step, h0, jnp.transpose(x, (1, 0, 2)))
        return jnp.transpose(hs_tm, (1, 0, 2)), h_last[None]

    hs_ref, hy_ref = ref(x, w_ih, w_hh, b_ih, b_hh)
    assert hs.shape == (B, T, H) and hy.shape == (1, B, H)
    # bf16 gi storage + bf16 MXU operands (f32 carry / accum / gate math) ->
    # compare against the f32 reference with a bf16-appropriate tolerance.
    assert jnp.allclose(hs, hs_ref, atol=3e-2, rtol=3e-2), "hs mismatch"
    assert jnp.allclose(hy, hy_ref, atol=3e-2, rtol=3e-2), "hy mismatch"

    print("KERNEL_OK")
</pallas_src>

<mosaic_0001>
module attributes {stable_mosaic.version = 11 : i64} {
  func.func @_gru_recurrence_kernel(%arg0: i32, %arg1: i32, %arg2: memref<2x8x384xbf16, #tpu.memory_space<vmem>>, %arg3: memref<128x384xbf16, #tpu.memory_space<vmem>>, %arg4: memref<1x128xf32, #tpu.memory_space<vmem>>, %arg5: memref<2x8x128xf32, #tpu.memory_space<vmem>>, %arg6: memref<2x128xf32, #tpu.memory_space<vmem>>) attributes {dimension_semantics = [#tpu.dimension_semantics<parallel>, #tpu.dimension_semantics<arbitrary>], iteration_bounds = array<i64: 1, 1>, scalar_prefetch = 0 : i64, scratch_operands = 1 : i64, tpu.core_type = #tpu.core_type<tc>, window_params = [{transform_indices = @transform_0, window_bounds = array<i64: 2, 8, 384>}, {pipeline_mode = #tpu.pipeline_mode<synchronous>, transform_indices = @transform_1, window_bounds = array<i64: 128, 384>}, {pipeline_mode = #tpu.pipeline_mode<synchronous>, transform_indices = @transform_2, window_bounds = array<i64: 1, 128>}, {transform_indices = @transform_3, window_bounds = array<i64: 2, 8, 128>}]} {
    %c0_i32 = arith.constant 0 : i32
    %0 = arith.cmpi eq, %arg1, %c0_i32 : i32
    %1 = arith.extui %0 : i1 to i32
    %c0_i32_0 = arith.constant 0 : i32
    %2 = arith.cmpi ne, %1, %c0_i32_0 : i32
    scf.if %2 {
      %cst_86 = arith.constant 0.000000e+00 : f32
      %280 = vector.broadcast %cst_86 : f32 to vector<2x128xf32>
      %c0_87 = arith.constant 0 : index
      %c0_88 = arith.constant 0 : index
      %281 = vector.load %arg6[%c0_87, %c0_88] : memref<2x128xf32, #tpu.memory_space<vmem>>, vector<2x128xf32>
      tpu.vector_store %arg6[%c0_87, %c0_88], %280 {strides = array<i32>} : memref<2x128xf32, #tpu.memory_space<vmem>>, vector<2x128xf32>,
    } else {
    }
    %c0 = arith.constant 0 : index
    %c0_1 = arith.constant 0 : index
    %3 = vector.load %arg6[%c0, %c0_1] : memref<2x128xf32, #tpu.memory_space<vmem>>, vector<2x128xf32>
    %c0_2 = arith.constant 0 : index
    %c0_3 = arith.constant 0 : index
    %4 = vector.load %arg4[%c0_2, %c0_3] : memref<1x128xf32, #tpu.memory_space<vmem>>, vector<1x128xf32>
    %5 = vector.shape_cast %4 : vector<1x128xf32> to vector<1x128xf32>
    %6 = vector.broadcast %5 : vector<1x128xf32> to vector<2x128xf32>
    %c0_4 = arith.constant 0 : index
    %c0_5 = arith.constant 0 : index
    %c0_6 = arith.constant 0 : index
    %7 = vector.load %arg2[%c0_4, %c0_5, %c0_6] : memref<2x8x384xbf16, #tpu.memory_space<vmem>>, vector<2x1x384xbf16>
    %8 = vector.shape_cast %7 : vector<2x1x384xbf16> to vector<2x384xbf16>
    %9 = arith.extf %8 : vector<2x384xbf16> to vector<2x384xf32>
    %10 = arith.truncf %3 : vector<2x128xf32> to vector<2x128xbf16>
    %c0_7 = arith.constant 0 : index
    %c0_8 = arith.constant 0 : index
    %11 = vector.load %arg3[%c0_7, %c0_8] : memref<128x384xbf16, #tpu.memory_space<vmem>>, vector<128x384xbf16>
    %cst = arith.constant dense<0.000000e+00> : vector<2x384xf32>
    %12 = tpu.matmul %10, %11, %cst {dimension_numbers = #tpu.dot_dimension_numbers<[1], [0], [0], [1], [0, 0, 1, 1], [], []>} : vector<2x128xbf16>, vector<128x384xbf16>, vector<2x384xf32> -> vector<2x384xf32>
    %13 = vector.extract_strided_slice %9 {offsets = [0, 0], sizes = [2, 128], strides = [1, 1]} : vector<2x384xf32> to vector<2x128xf32>
    %14 = vector.extract_strided_slice %12 {offsets = [0, 0], sizes = [2, 128], strides = [1, 1]} : vector<2x384xf32> to vector<2x128xf32>
    %15 = arith.addf %13, %14 : vector<2x128xf32>
    %16 = arith.negf %15 : vector<2x128xf32>
    %17 = math.exp %16 : vector<2x128xf32>
    %cst_9 = arith.constant 1.000000e+00 : f32
    %18 = vector.broadcast %cst_9 : f32 to vector<2x128xf32>
    %19 = arith.addf %18, %17 : vector<2x128xf32>
    %20 = arith.divf %18, %19 : vector<2x128xf32>
    %21 = vector.extract_strided_slice %9 {offsets = [0, 128], sizes = [2, 128], strides = [1, 1]} : vector<2x384xf32> to vector<2x128xf32>
    %22 = vector.extract_strided_slice %12 {offsets = [0, 128], sizes = [2, 128], strides = [1, 1]} : vector<2x384xf32> to vector<2x128xf32>
    %23 = arith.addf %21, %22 : vector<2x128xf32>
    %24 = arith.negf %23 : vector<2x128xf32>
    %25 = math.exp %24 : vector<2x128xf32>
    %cst_10 = arith.constant 1.000000e+00 : f32
    %26 = vector.broadcast %cst_10 : f32 to vector<2x128xf32>
    %27 = arith.addf %26, %25 : vector<2x128xf32>
    %28 = arith.divf %26, %27 : vector<2x128xf32>
    %29 = vector.extract_strided_slice %9 {offsets = [0, 256], sizes = [2, 128], strides = [1, 1]} : vector<2x384xf32> to vector<2x128xf32>
    %30 = vector.extract_strided_slice %12 {offsets = [0, 256], sizes = [2, 128], strides = [1, 1]} : vector<2x384xf32> to vector<2x128xf32>
    %31 = arith.addf %30, %6 : vector<2x128xf32>
    %32 = arith.mulf %20, %31 : vector<2x128xf32>
    %33 = arith.addf %29, %32 : vector<2x128xf32>
    %34 = math.tanh %33 : vector<2x128xf32>
    %35 = arith.subf %3, %34 : vector<2x128xf32>
    %36 = arith.mulf %28, %35 : vector<2x128xf32>
    %37 = arith.addf %34, %36 : vector<2x128xf32>
    %c0_11 = arith.constant 0 : index
    %c0_12 = arith.constant 0 : index
    %c0_13 = arith.constant 0 : index
    %38 = vector.load %arg5[%c0_11, %c0_12, %c0_13] : memref<2x8x128xf32, #tpu.memory_space<vmem>>, vector<2x1x128xf32>
    %39 = vector.shape_cast %38 : vector<2x1x128xf32> to vector<2x128xf32>
    %40 = vector.shape_cast %37 : vector<2x128xf32> to vector<2x1x128xf32>
    tpu.vector_store %arg5[%c0_11, %c0_12, %c0_13], %40 {strides = array<i32>} : memref<2x8x128xf32, #tpu.memory_space<vmem>>, vector<2x1x128xf32>,
    %c0_14 = arith.constant 0 : index
    %c1 = arith.constant 1 : index
    %c0_15 = arith.constant 0 : index
    %41 = vector.load %arg2[%c0_14, %c1, %c0_15] : memref<2x8x384xbf16, #tpu.memory_space<vmem>>, vector<2x1x384xbf16>
    %42 = vector.shape_cast %41 : vector<2x1x384xbf16> to vector<2x384xbf16>
    %43 = arith.extf %42 : vector<2x384xbf16> to vector<2x384xf32>
    %44 = arith.truncf %37 : vector<2x128xf32> to vector<2x128xbf16>
    %c0_16 = arith.constant 0 : index
    %c0_17 = arith.constant 0 : index
    %45 = vector.load %arg3[%c0_16, %c0_17] : memref<128x384xbf16, #tpu.memory_space<vmem>>, vector<128x384xbf16>
    %cst_18 = arith.constant dense<0.000000e+00> : vector<2x384xf32>
    %46 = tpu.matmul %44, %45, %cst_18 {dimension_numbers = #tpu.dot_dimension_numbers<[1], [0], [0], [1], [0, 0, 1, 1], [], []>} : vector<2x128xbf16>, vector<128x384xbf16>, vector<2x384xf32> -> vector<2x384xf32>
    %47 = vector.extract_strided_slice %43 {offsets = [0, 0], sizes = [2, 128], strides = [1, 1]} : vector<2x384xf32> to vector<2x128xf32>
    %48 = vector.extract_strided_slice %46 {offsets = [0, 0], sizes = [2, 128], strides = [1, 1]} : vector<2x384xf32> to vector<2x128xf32>
    %49 = arith.addf %47, %48 : vector<2x128xf32>
    %50 = arith.negf %49 : vector<2x128xf32>
    %51 = math.exp %50 : vector<2x128xf32>
    %cst_19 = arith.constant 1.000000e+00 : f32
    %52 = vector.broadcast %cst_19 : f32 to vector<2x128xf32>
    %53 = arith.addf %52, %51 : vector<2x128xf32>
    %54 = arith.divf %52, %53 : vector<2x128xf32>
    %55 = vector.extract_strided_slice %43 {offsets = [0, 128], sizes = [2, 128], strides = [1, 1]} : vector<2x384xf32> to vector<2x128xf32>
    %56 = vector.extract_strided_slice %46 {offsets = [0, 128], sizes = [2, 128], strides = [1, 1]} : vector<2x384xf32> to vector<2x128xf32>
    %57 = arith.addf %55, %56 : vector<2x128xf32>
    %58 = arith.negf %57 : vector<2x128xf32>
    %59 = math.exp %58 : vector<2x128xf32>
    %cst_20 = arith.constant 1.000000e+00 : f32
    %60 = vector.broadcast %cst_20 : f32 to vector<2x128xf32>
    %61 = arith.addf %60, %59 : vector<2x128xf32>
    %62 = arith.divf %60, %61 : vector<2x128xf32>
    %63 = vector.extract_strided_slice %43 {offsets = [0, 256], sizes = [2, 128], strides = [1, 1]} : vector<2x384xf32> to vector<2x128xf32>
    %64 = vector.extract_strided_slice %46 {offsets = [0, 256], sizes = [2, 128], strides = [1, 1]} : vector<2x384xf32> to vector<2x128xf32>
    %65 = arith.addf %64, %6 : vector<2x128xf32>
    %66 = arith.mulf %54, %65 : vector<2x128xf32>
    %67 = arith.addf %63, %66 : vector<2x128xf32>
    %68 = math.tanh %67 : vector<2x128xf32>
    %69 = arith.subf %37, %68 : vector<2x128xf32>
    %70 = arith.mulf %62, %69 : vector<2x128xf32>
    %71 = arith.addf %68, %70 : vector<2x128xf32>
    %c0_21 = arith.constant 0 : index
    %c1_22 = arith.constant 1 : index
    %c0_23 = arith.constant 0 : index
    %72 = vector.load %arg5[%c0_21, %c1_22, %c0_23] : memref<2x8x128xf32, #tpu.memory_space<vmem>>, vector<2x1x128xf32>
    %73 = vector.shape_cast %72 : vector<2x1x128xf32> to vector<2x128xf32>
    %74 = vector.shape_cast %71 : vector<2x128xf32> to vector<2x1x128xf32>
    tpu.vector_store %arg5[%c0_21, %c1_22, %c0_23], %74 {strides = array<i32>} : memref<2x8x128xf32, #tpu.memory_space<vmem>>, vector<2x1x128xf32>,
    %c0_24 = arith.constant 0 : index
    %c2 = arith.constant 2 : index
    %c0_25 = arith.constant 0 : index
    %75 = vector.load %arg2[%c0_24, %c2, %c0_25] : memref<2x8x384xbf16, #tpu.memory_space<vmem>>, vector<2x1x384xbf16>
    %76 = vector.shape_cast %75 : vector<2x1x384xbf16> to vector<2x384xbf16>
    %77 = arith.extf %76 : vector<2x384xbf16> to vector<2x384xf32>
    %78 = arith.truncf %71 : vector<2x128xf32> to vector<2x128xbf16>
    %c0_26 = arith.constant 0 : index
    %c0_27 = arith.constant 0 : index
    %79 = vector.load %arg3[%c0_26, %c0_27] : memref<128x384xbf16, #tpu.memory_space<vmem>>, vector<128x384xbf16>
    %cst_28 = arith.constant dense<0.000000e+00> : vector<2x384xf32>
    %80 = tpu.matmul %78, %79, %cst_28 {dimension_numbers = #tpu.dot_dimension_numbers<[1], [0], [0], [1], [0, 0, 1, 1], [], []>} : vector<2x128xbf16>, vector<128x384xbf16>, vector<2x384xf32> -> vector<2x384xf32>
    %81 = vector.extract_strided_slice %77 {offsets = [0, 0], sizes = [2, 128], strides = [1, 1]} : vector<2x384xf32> to vector<2x128xf32>
    %82 = vector.extract_strided_slice %80 {offsets = [0, 0], sizes = [2, 128], strides = [1, 1]} : vector<2x384xf32> to vector<2x128xf32>
    %83 = arith.addf %81, %82 : vector<2x128xf32>
    %84 = arith.negf %83 : vector<2x128xf32>
    %85 = math.exp %84 : vector<2x128xf32>
    %cst_29 = arith.constant 1.000000e+00 : f32
    %86 = vector.broadcast %cst_29 : f32 to vector<2x128xf32>
    %87 = arith.addf %86, %85 : vector<2x128xf32>
    %88 = arith.divf %86, %87 : vector<2x128xf32>
    %89 = vector.extract_strided_slice %77 {offsets = [0, 128], sizes = [2, 128], strides = [1, 1]} : vector<2x384xf32> to vector<2x128xf32>
    %90 = vector.extract_strided_slice %80 {offsets = [0, 128], sizes = [2, 128], strides = [1, 1]} : vector<2x384xf32> to vector<2x128xf32>
    %91 = arith.addf %89, %90 : vector<2x128xf32>
    %92 = arith.negf %91 : vector<2x128xf32>
    %93 = math.exp %92 : vector<2x128xf32>
    %cst_30 = arith.constant 1.000000e+00 : f32
    %94 = vector.broadcast %cst_30 : f32 to vector<2x128xf32>
    %95 = arith.addf %94, %93 : vector<2x128xf32>
    %96 = arith.divf %94, %95 : vector<2x128xf32>
    %97 = vector.extract_strided_slice %77 {offsets = [0, 256], sizes = [2, 128], strides = [1, 1]} : vector<2x384xf32> to vector<2x128xf32>
    %98 = vector.extract_strided_slice %80 {offsets = [0, 256], sizes = [2, 128], strides = [1, 1]} : vector<2x384xf32> to vector<2x128xf32>
    %99 = arith.addf %98, %6 : vector<2x128xf32>
    %100 = arith.mulf %88, %99 : vector<2x128xf32>
    %101 = arith.addf %97, %100 : vector<2x128xf32>
    %102 = math.tanh %101 : vector<2x128xf32>
    %103 = arith.subf %71, %102 : vector<2x128xf32>
    %104 = arith.mulf %96, %103 : vector<2x128xf32>
    %105 = arith.addf %102, %104 : vector<2x128xf32>
    %c0_31 = arith.constant 0 : index
    %c2_32 = arith.constant 2 : index
    %c0_33 = arith.constant 0 : index
    %106 = vector.load %arg5[%c0_31, %c2_32, %c0_33] : memref<2x8x128xf32, #tpu.memory_space<vmem>>, vector<2x1x128xf32>
    %107 = vector.shape_cast %106 : vector<2x1x128xf32> to vector<2x128xf32>
    %108 = vector.shape_cast %105 : vector<2x128xf32> to vector<2x1x128xf32>
    tpu.vector_store %arg5[%c0_31, %c2_32, %c0_33], %108 {strides = array<i32>} : memref<2x8x128xf32, #tpu.memory_space<vmem>>, vector<2x1x128xf32>,
    %c0_34 = arith.constant 0 : index
    %c3 = arith.constant 3 : index
    %c0_35 = arith.constant 0 : index
    %109 = vector.load %arg2[%c0_34, %c3, %c0_35] : memref<2x8x384xbf16, #tpu.memory_space<vmem>>, vector<2x1x384xbf16>
    %110 = vector.shape_cast %109 : vector<2x1x384xbf16> to vector<2x384xbf16>
    %111 = arith.extf %110 : vector<2x384xbf16> to vector<2x384xf32>
    %112 = arith.truncf %105 : vector<2x128xf32> to vector<2x128xbf16>
    %c0_36 = arith.constant 0 : index
    %c0_37 = arith.constant 0 : index
    %113 = vector.load %arg3[%c0_36, %c0_37] : memref<128x384xbf16, #tpu.memory_space<vmem>>, vector<128x384xbf16>
    %cst_38 = arith.constant dense<0.000000e+00> : vector<2x384xf32>
    %114 = tpu.matmul %112, %113, %cst_38 {dimension_numbers = #tpu.dot_dimension_numbers<[1], [0], [0], [1], [0, 0, 1, 1], [], []>} : vector<2x128xbf16>, vector<128x384xbf16>, vector<2x384xf32> -> vector<2x384xf32>
    %115 = vector.extract_strided_slice %111 {offsets = [0, 0], sizes = [2, 128], strides = [1, 1]} : vector<2x384xf32> to vector<2x128xf32>
    %116 = vector.extract_strided_slice %114 {offsets = [0, 0], sizes = [2, 128], strides = [1, 1]} : vector<2x384xf32> to vector<2x128xf32>
    %117 = arith.addf %115, %116 : vector<2x128xf32>
    %118 = arith.negf %117 : vector<2x128xf32>
    %119 = math.exp %118 : vector<2x128xf32>
    %cst_39 = arith.constant 1.000000e+00 : f32
    %120 = vector.broadcast %cst_39 : f32 to vector<2x128xf32>
    %121 = arith.addf %120, %119 : vector<2x128xf32>
    %122 = arith.divf %120, %121 : vector<2x128xf32>
    %123 = vector.extract_strided_slice %111 {offsets = [0, 128], sizes = [2, 128], strides = [1, 1]} : vector<2x384xf32> to vector<2x128xf32>
    %124 = vector.extract_strided_slice %114 {offsets = [0, 128], sizes = [2, 128], strides = [1, 1]} : vector<2x384xf32> to vector<2x128xf32>
    %125 = arith.addf %123, %124 : vector<2x128xf32>
    %126 = arith.negf %125 : vector<2x128xf32>
    %127 = math.exp %126 : vector<2x128xf32>
    %cst_40 = arith.constant 1.000000e+00 : f32
    %128 = vector.broadcast %cst_40 : f32 to vector<2x128xf32>
    %129 = arith.addf %128, %127 : vector<2x128xf32>
    %130 = arith.divf %128, %129 : vector<2x128xf32>
    %131 = vector.extract_strided_slice %111 {offsets = [0, 256], sizes = [2, 128], strides = [1, 1]} : vector<2x384xf32> to vector<2x128xf32>
    %132 = vector.extract_strided_slice %114 {offsets = [0, 256], sizes = [2, 128], strides = [1, 1]} : vector<2x384xf32> to vector<2x128xf32>
    %133 = arith.addf %132, %6 : vector<2x128xf32>
    %134 = arith.mulf %122, %133 : vector<2x128xf32>
    %135 = arith.addf %131, %134 : vector<2x128xf32>
    %136 = math.tanh %135 : vector<2x128xf32>
    %137 = arith.subf %105, %136 : vector<2x128xf32>
    %138 = arith.mulf %130, %137 : vector<2x128xf32>
    %139 = arith.addf %136, %138 : vector<2x128xf32>
    %c0_41 = arith.constant 0 : index
    %c3_42 = arith.constant 3 : index
    %c0_43 = arith.constant 0 : index
    %140 = vector.load %arg5[%c0_41, %c3_42, %c0_43] : memref<2x8x128xf32, #tpu.memory_space<vmem>>, vector<2x1x128xf32>
    %141 = vector.shape_cast %140 : vector<2x1x128xf32> to vector<2x128xf32>
    %142 = vector.shape_cast %139 : vector<2x128xf32> to vector<2x1x128xf32>
    tpu.vector_store %arg5[%c0_41, %c3_42, %c0_43], %142 {strides = array<i32>} : memref<2x8x128xf32, #tpu.memory_space<vmem>>, vector<2x1x128xf32>,
    %c0_44 = arith.constant 0 : index
    %c4 = arith.constant 4 : index
    %c0_45 = arith.constant 0 : index
    %143 = vector.load %arg2[%c0_44, %c4, %c0_45] : memref<2x8x384xbf16, #tpu.memory_space<vmem>>, vector<2x1x384xbf16>
    %144 = vector.shape_cast %143 : vector<2x1x384xbf16> to vector<2x384xbf16>
    %145 = arith.extf %144 : vector<2x384xbf16> to vector<2x384xf32>
    %146 = arith.truncf %139 : vector<2x128xf32> to vector<2x128xbf16>
    %c0_46 = arith.constant 0 : index
    %c0_47 = arith.constant 0 : index
    %147 = vector.load %arg3[%c0_46, %c0_47] : memref<128x384xbf16, #tpu.memory_space<vmem>>, vector<128x384xbf16>
    %cst_48 = arith.constant dense<0.000000e+00> : vector<2x384xf32>
    %148 = tpu.matmul %146, %147, %cst_48 {dimension_numbers = #tpu.dot_dimension_numbers<[1], [0], [0], [1], [0, 0, 1, 1], [], []>} : vector<2x128xbf16>, vector<128x384xbf16>, vector<2x384xf32> -> vector<2x384xf32>
    %149 = vector.extract_strided_slice %145 {offsets = [0, 0], sizes = [2, 128], strides = [1, 1]} : vector<2x384xf32> to vector<2x128xf32>
    %150 = vector.extract_strided_slice %148 {offsets = [0, 0], sizes = [2, 128], strides = [1, 1]} : vector<2x384xf32> to vector<2x128xf32>
    %151 = arith.addf %149, %150 : vector<2x128xf32>
    %152 = arith.negf %151 : vector<2x128xf32>
    %153 = math.exp %152 : vector<2x128xf32>
    %cst_49 = arith.constant 1.000000e+00 : f32
    %154 = vector.broadcast %cst_49 : f32 to vector<2x128xf32>
    %155 = arith.addf %154, %153 : vector<2x128xf32>
    %156 = arith.divf %154, %155 : vector<2x128xf32>
    %157 = vector.extract_strided_slice %145 {offsets = [0, 128], sizes = [2, 128], strides = [1, 1]} : vector<2x384xf32> to vector<2x128xf32>
    %158 = vector.extract_strided_slice %148 {offsets = [0, 128], sizes = [2, 128], strides = [1, 1]} : vector<2x384xf32> to vector<2x128xf32>
    %159 = arith.addf %157, %158 : vector<2x128xf32>
    %160 = arith.negf %159 : vector<2x128xf32>
    %161 = math.exp %160 : vector<2x128xf32>
    %cst_50 = arith.constant 1.000000e+00 : f32
    %162 = vector.broadcast %cst_50 : f32 to vector<2x128xf32>
    %163 = arith.addf %162, %161 : vector<2x128xf32>
    %164 = arith.divf %162, %163 : vector<2x128xf32>
    %165 = vector.extract_strided_slice %145 {offsets = [0, 256], sizes = [2, 128], strides = [1, 1]} : vector<2x384xf32> to vector<2x128xf32>
    %166 = vector.extract_strided_slice %148 {offsets = [0, 256], sizes = [2, 128], strides = [1, 1]} : vector<2x384xf32> to vector<2x128xf32>
    %167 = arith.addf %166, %6 : vector<2x128xf32>
    %168 = arith.mulf %156, %167 : vector<2x128xf32>
    %169 = arith.addf %165, %168 : vector<2x128xf32>
    %170 = math.tanh %169 : vector<2x128xf32>
    %171 = arith.subf %139, %170 : vector<2x128xf32>
    %172 = arith.mulf %164, %171 : vector<2x128xf32>
    %173 = arith.addf %170, %172 : vector<2x128xf32>
    %c0_51 = arith.constant 0 : index
    %c4_52 = arith.constant 4 : index
    %c0_53 = arith.constant 0 : index
    %174 = vector.load %arg5[%c0_51, %c4_52, %c0_53] : memref<2x8x128xf32, #tpu.memory_space<vmem>>, vector<2x1x128xf32>
    %175 = vector.shape_cast %174 : vector<2x1x128xf32> to vector<2x128xf32>
    %176 = vector.shape_cast %173 : vector<2x128xf32> to vector<2x1x128xf32>
    tpu.vector_store %arg5[%c0_51, %c4_52, %c0_53], %176 {strides = array<i32>} : memref<2x8x128xf32, #tpu.memory_space<vmem>>, vector<2x1x128xf32>,
    %c0_54 = arith.constant 0 : index
    %c5 = arith.constant 5 : index
    %c0_55 = arith.constant 0 : index
    %177 = vector.load %arg2[%c0_54, %c5, %c0_55] : memref<2x8x384xbf16, #tpu.memory_space<vmem>>, vector<2x1x384xbf16>
    %178 = vector.shape_cast %177 : vector<2x1x384xbf16> to vector<2x384xbf16>
    %179 = arith.extf %178 : vector<2x384xbf16> to vector<2x384xf32>
    %180 = arith.truncf %173 : vector<2x128xf32> to vector<2x128xbf16>
    %c0_56 = arith.constant 0 : index
    %c0_57 = arith.constant 0 : index
    %181 = vector.load %arg3[%c0_56, %c0_57] : memref<128x384xbf16, #tpu.memory_space<vmem>>, vector<128x384xbf16>
    %cst_58 = arith.constant dense<0.000000e+00> : vector<2x384xf32>
    %182 = tpu.matmul %180, %181, %cst_58 {dimension_numbers = #tpu.dot_dimension_numbers<[1], [0], [0], [1], [0, 0, 1, 1], [], []>} : vector<2x128xbf16>, vector<128x384xbf16>, vector<2x384xf32> -> vector<2x384xf32>
    %183 = vector.extract_strided_slice %179 {offsets = [0, 0], sizes = [2, 128], strides = [1, 1]} : vector<2x384xf32> to vector<2x128xf32>
    %184 = vector.extract_strided_slice %182 {offsets = [0, 0], sizes = [2, 128], strides = [1, 1]} : vector<2x384xf32> to vector<2x128xf32>
    %185 = arith.addf %183, %184 : vector<2x128xf32>
    %186 = arith.negf %185 : vector<2x128xf32>
    %187 = math.exp %186 : vector<2x128xf32>
    %cst_59 = arith.constant 1.000000e+00 : f32
    %188 = vector.broadcast %cst_59 : f32 to vector<2x128xf32>
    %189 = arith.addf %188, %187 : vector<2x128xf32>
    %190 = arith.divf %188, %189 : vector<2x128xf32>
    %191 = vector.extract_strided_slice %179 {offsets = [0, 128], sizes = [2, 128], strides = [1, 1]} : vector<2x384xf32> to vector<2x128xf32>
    %192 = vector.extract_strided_slice %182 {offsets = [0, 128], sizes = [2, 128], strides = [1, 1]} : vector<2x384xf32> to vector<2x128xf32>
    %193 = arith.addf %191, %192 : vector<2x128xf32>
    %194 = arith.negf %193 : vector<2x128xf32>
    %195 = math.exp %194 : vector<2x128xf32>
    %cst_60 = arith.constant 1.000000e+00 : f32
    %196 = vector.broadcast %cst_60 : f32 to vector<2x128xf32>
    %197 = arith.addf %196, %195 : vector<2x128xf32>
    %198 = arith.divf %196, %197 : vector<2x128xf32>
    %199 = vector.extract_strided_slice %179 {offsets = [0, 256], sizes = [2, 128], strides = [1, 1]} : vector<2x384xf32> to vector<2x128xf32>
    %200 = vector.extract_strided_slice %182 {offsets = [0, 256], sizes = [2, 128], strides = [1, 1]} : vector<2x384xf32> to vector<2x128xf32>
    %201 = arith.addf %200, %6 : vector<2x128xf32>
    %202 = arith.mulf %190, %201 : vector<2x128xf32>
    %203 = arith.addf %199, %202 : vector<2x128xf32>
    %204 = math.tanh %203 : vector<2x128xf32>
    %205 = arith.subf %173, %204 : vector<2x128xf32>
    %206 = arith.mulf %198, %205 : vector<2x128xf32>
    %207 = arith.addf %204, %206 : vector<2x128xf32>
    %c0_61 = arith.constant 0 : index
    %c5_62 = arith.constant 5 : index
    %c0_63 = arith.constant 0 : index
    %208 = vector.load %arg5[%c0_61, %c5_62, %c0_63] : memref<2x8x128xf32, #tpu.memory_space<vmem>>, vector<2x1x128xf32>
    %209 = vector.shape_cast %208 : vector<2x1x128xf32> to vector<2x128xf32>
    %210 = vector.shape_cast %207 : vector<2x128xf32> to vector<2x1x128xf32>
    tpu.vector_store %arg5[%c0_61, %c5_62, %c0_63], %210 {strides = array<i32>} : memref<2x8x128xf32, #tpu.memory_space<vmem>>, vector<2x1x128xf32>,
    %c0_64 = arith.constant 0 : index
    %c6 = arith.constant 6 : index
    %c0_65 = arith.constant 0 : index
    %211 = vector.load %arg2[%c0_64, %c6, %c0_65] : memref<2x8x384xbf16, #tpu.memory_space<vmem>>, vector<2x1x384xbf16>
    %212 = vector.shape_cast %211 : vector<2x1x384xbf16> to vector<2x384xbf16>
    %213 = arith.extf %212 : vector<2x384xbf16> to vector<2x384xf32>
    %214 = arith.truncf %207 : vector<2x128xf32> to vector<2x128xbf16>
    %c0_66 = arith.constant 0 : index
    %c0_67 = arith.constant 0 : index
    %215 = vector.load %arg3[%c0_66, %c0_67] : memref<128x384xbf16, #tpu.memory_space<vmem>>, vector<128x384xbf16>
    %cst_68 = arith.constant dense<0.000000e+00> : vector<2x384xf32>
    %216 = tpu.matmul %214, %215, %cst_68 {dimension_numbers = #tpu.dot_dimension_numbers<[1], [0], [0], [1], [0, 0, 1, 1], [], []>} : vector<2x128xbf16>, vector<128x384xbf16>, vector<2x384xf32> -> vector<2x384xf32>
    %217 = vector.extract_strided_slice %213 {offsets = [0, 0], sizes = [2, 128], strides = [1, 1]} : vector<2x384xf32> to vector<2x128xf32>
    %218 = vector.extract_strided_slice %216 {offsets = [0, 0], sizes = [2, 128], strides = [1, 1]} : vector<2x384xf32> to vector<2x128xf32>
    %219 = arith.addf %217, %218 : vector<2x128xf32>
    %220 = arith.negf %219 : vector<2x128xf32>
    %221 = math.exp %220 : vector<2x128xf32>
    %cst_69 = arith.constant 1.000000e+00 : f32
    %222 = vector.broadcast %cst_69 : f32 to vector<2x128xf32>
    %223 = arith.addf %222, %221 : vector<2x128xf32>
    %224 = arith.divf %222, %223 : vector<2x128xf32>
    %225 = vector.extract_strided_slice %213 {offsets = [0, 128], sizes = [2, 128], strides = [1, 1]} : vector<2x384xf32> to vector<2x128xf32>
    %226 = vector.extract_strided_slice %216 {offsets = [0, 128], sizes = [2, 128], strides = [1, 1]} : vector<2x384xf32> to vector<2x128xf32>
    %227 = arith.addf %225, %226 : vector<2x128xf32>
    %228 = arith.negf %227 : vector<2x128xf32>
    %229 = math.exp %228 : vector<2x128xf32>
    %cst_70 = arith.constant 1.000000e+00 : f32
    %230 = vector.broadcast %cst_70 : f32 to vector<2x128xf32>
    %231 = arith.addf %230, %229 : vector<2x128xf32>
    %232 = arith.divf %230, %231 : vector<2x128xf32>
    %233 = vector.extract_strided_slice %213 {offsets = [0, 256], sizes = [2, 128], strides = [1, 1]} : vector<2x384xf32> to vector<2x128xf32>
    %234 = vector.extract_strided_slice %216 {offsets = [0, 256], sizes = [2, 128], strides = [1, 1]} : vector<2x384xf32> to vector<2x128xf32>
    %235 = arith.addf %234, %6 : vector<2x128xf32>
    %236 = arith.mulf %224, %235 : vector<2x128xf32>
    %237 = arith.addf %233, %236 : vector<2x128xf32>
    %238 = math.tanh %237 : vector<2x128xf32>
    %239 = arith.subf %207, %238 : vector<2x128xf32>
    %240 = arith.mulf %232, %239 : vector<2x128xf32>
    %241 = arith.addf %238, %240 : vector<2x128xf32>
    %c0_71 = arith.constant 0 : index
    %c6_72 = arith.constant 6 : index
    %c0_73 = arith.constant 0 : index
    %242 = vector.load %arg5[%c0_71, %c6_72, %c0_73] : memref<2x8x128xf32, #tpu.memory_space<vmem>>, vector<2x1x128xf32>
    %243 = vector.shape_cast %242 : vector<2x1x128xf32> to vector<2x128xf32>
    %244 = vector.shape_cast %241 : vector<2x128xf32> to vector<2x1x128xf32>
    tpu.vector_store %arg5[%c0_71, %c6_72, %c0_73], %244 {strides = array<i32>} : memref<2x8x128xf32, #tpu.memory_space<vmem>>, vector<2x1x128xf32>,
    %c0_74 = arith.constant 0 : index
    %c7 = arith.constant 7 : index
    %c0_75 = arith.constant 0 : index
    %245 = vector.load %arg2[%c0_74, %c7, %c0_75] : memref<2x8x384xbf16, #tpu.memory_space<vmem>>, vector<2x1x384xbf16>
    %246 = vector.shape_cast %245 : vector<2x1x384xbf16> to vector<2x384xbf16>
    %247 = arith.extf %246 : vector<2x384xbf16> to vector<2x384xf32>
    %248 = arith.truncf %241 : vector<2x128xf32> to vector<2x128xbf16>
    %c0_76 = arith.constant 0 : index
    %c0_77 = arith.constant 0 : index
    %249 = vector.load %arg3[%c0_76, %c0_77] : memref<128x384xbf16, #tpu.memory_space<vmem>>, vector<128x384xbf16>
    %cst_78 = arith.constant dense<0.000000e+00> : vector<2x384xf32>
    %250 = tpu.matmul %248, %249, %cst_78 {dimension_numbers = #tpu.dot_dimension_numbers<[1], [0], [0], [1], [0, 0, 1, 1], [], []>} : vector<2x128xbf16>, vector<128x384xbf16>, vector<2x384xf32> -> vector<2x384xf32>
    %251 = vector.extract_strided_slice %247 {offsets = [0, 0], sizes = [2, 128], strides = [1, 1]} : vector<2x384xf32> to vector<2x128xf32>
    %252 = vector.extract_strided_slice %250 {offsets = [0, 0], sizes = [2, 128], strides = [1, 1]} : vector<2x384xf32> to vector<2x128xf32>
    %253 = arith.addf %251, %252 : vector<2x128xf32>
    %254 = arith.negf %253 : vector<2x128xf32>
    %255 = math.exp %254 : vector<2x128xf32>
    %cst_79 = arith.constant 1.000000e+00 : f32
    %256 = vector.broadcast %cst_79 : f32 to vector<2x128xf32>
    %257 = arith.addf %256, %255 : vector<2x128xf32>
    %258 = arith.divf %256, %257 : vector<2x128xf32>
    %259 = vector.extract_strided_slice %247 {offsets = [0, 128], sizes = [2, 128], strides = [1, 1]} : vector<2x384xf32> to vector<2x128xf32>
    %260 = vector.extract_strided_slice %250 {offsets = [0, 128], sizes = [2, 128], strides = [1, 1]} : vector<2x384xf32> to vector<2x128xf32>
    %261 = arith.addf %259, %260 : vector<2x128xf32>
    %262 = arith.negf %261 : vector<2x128xf32>
    %263 = math.exp %262 : vector<2x128xf32>
    %cst_80 = arith.constant 1.000000e+00 : f32
    %264 = vector.broadcast %cst_80 : f32 to vector<2x128xf32>
    %265 = arith.addf %264, %263 : vector<2x128xf32>
    %266 = arith.divf %264, %265 : vector<2x128xf32>
    %267 = vector.extract_strided_slice %247 {offsets = [0, 256], sizes = [2, 128], strides = [1, 1]} : vector<2x384xf32> to vector<2x128xf32>
    %268 = vector.extract_strided_slice %250 {offsets = [0, 256], sizes = [2, 128], strides = [1, 1]} : vector<2x384xf32> to vector<2x128xf32>
    %269 = arith.addf %268, %6 : vector<2x128xf32>
    %270 = arith.mulf %258, %269 : vector<2x128xf32>
    %271 = arith.addf %267, %270 : vector<2x128xf32>
    %272 = math.tanh %271 : vector<2x128xf32>
    %273 = arith.subf %241, %272 : vector<2x128xf32>
    %274 = arith.mulf %266, %273 : vector<2x128xf32>
    %275 = arith.addf %272, %274 : vector<2x128xf32>
    %c0_81 = arith.constant 0 : index
    %c7_82 = arith.constant 7 : index
    %c0_83 = arith.constant 0 : index
    %276 = vector.load %arg5[%c0_81, %c7_82, %c0_83] : memref<2x8x128xf32, #tpu.memory_space<vmem>>, vector<2x1x128xf32>
    %277 = vector.shape_cast %276 : vector<2x1x128xf32> to vector<2x128xf32>
    %278 = vector.shape_cast %275 : vector<2x128xf32> to vector<2x1x128xf32>
    tpu.vector_store %arg5[%c0_81, %c7_82, %c0_83], %278 {strides = array<i32>} : memref<2x8x128xf32, #tpu.memory_space<vmem>>, vector<2x1x128xf32>,
    %c0_84 = arith.constant 0 : index
    %c0_85 = arith.constant 0 : index
    %279 = vector.load %arg6[%c0_84, %c0_85] : memref<2x128xf32, #tpu.memory_space<vmem>>, vector<2x128xf32>
    tpu.vector_store %arg6[%c0_84, %c0_85], %275 {strides = array<i32>} : memref<2x128xf32, #tpu.memory_space<vmem>>, vector<2x128xf32>,
    return
  }
  func.func @transform_0(%arg0: i32, %arg1: i32) -> (i32, i32, i32) {
    %c0_i32 = arith.constant 0 : i32
    %c0_i32_0 = arith.constant 0 : i32
    return %arg0, %arg1, %c0_i32 : i32, i32, i32
  }
  func.func @transform_1(%arg0: i32, %arg1: i32) -> (i32, i32) {
    %c0_i32 = arith.constant 0 : i32
    %c0_i32_0 = arith.constant 0 : i32
    %c0_i32_1 = arith.constant 0 : i32
    return %c0_i32, %c0_i32_0 : i32, i32
  }
  func.func @transform_2(%arg0: i32, %arg1: i32) -> (i32, i32) {
    %c0_i32 = arith.constant 0 : i32
    %c0_i32_0 = arith.constant 0 : i32
    %c0_i32_1 = arith.constant 0 : i32
    return %c0_i32, %c0_i32_0 : i32, i32
  }
  func.func @transform_3(%arg0: i32, %arg1: i32) -> (i32, i32, i32) {
    %c0_i32 = arith.constant 0 : i32
    %c0_i32_0 = arith.constant 0 : i32
    return %arg0, %arg1, %c0_i32 : i32, i32, i32
  }
}

</mosaic_0001>

<bundles_post_ra>
// kernel: gru_forward.1
= control target key start
LH: loop header
LB: loop body
LE: loop exit
PB: predicated region body
PF: predicated region fallthrough
CT: control target
= control target key end

     0   :  { %v3407_v1 = vmov 0.0   ;;  %v3408_v2 = vmov 0   ;;  %vm3409_vm0 = vmmov 0   ;;  %vm330_vm1 = vcmask 1041409   ;;  %s4258_s1 = inlined_call_operand.vmem [shape: bf16[128,384], index: 1, kind: input, shape index: {}]   ;;  %s4259_s0 = inlined_call_operand.vmem [shape: bf16[2,8,384], index: 0, kind: input, shape index: {}]   ;;  %s4260_s2 = inlined_call_operand.vmem [shape: f32[1,128], index: 2, kind: input, shape index: {}]   ;;  %s4261_s3 = inlined_call_operand.vmem [shape: f32[2,8,128], index: 3, kind: output, shape index: {}]  }
   0x1   :  { %v3433_v0 = vld [vmem:[%s4258_s1 + $0x4] ss:$12 sps:$4 sm:$0xff]   ;;  %2971 = vmatprep.subr.bf16.mxu1 %v3407_v1  ;;  %19 = vst [vmem:[#allocation2] sm:$0x3] %v3407_v1  ;;  %231 = vmatprep.mubr.bf16.mxu0 %v3408_v2  ;;  %v3441_v3 = vld [vmem:[%s4258_s1] ss:$12 sps:$4 sm:$0xff]  }
   0x2   :  { %2987 = vmatprep.mubr.msk.bf16.mxu1 %vm3409_vm0, %v3407_v1  ;;  %199 = vmatprep.subr.bf16.mxu0 %v3433_v0  ;;  %v3449_v4 = vld [vmem:[%s4258_s1 + $0x1c] ss:$12 sps:$4 sm:$0xff]   ;;  %v3455_v5 = vld [vmem:[%s4258_s1 + $0x18] ss:$12 sps:$4 sm:$0xff]   ;;  %v3461_v6 = vld [vmem:[%s4258_s1 + $0x34] ss:$12 sps:$4 sm:$0xff]  }
   0x3   :  { %200 = vmatpush1.bf16.msra.mxu0 %v3441_v3  ;;  %v3467_v7 = vld [vmem:[%s4258_s1 + $0x30] ss:$12 sps:$4 sm:$0xff]   ;;  %v3473_v8 = vld [vmem:[%s4258_s1 + $0x4c] ss:$12 sps:$4 sm:$0xff]   ;;  %v3154_v9 = vld [vmem:[%s4258_s1 + $0x8] ss:$12 sps:$4 sm:$0xff]  }
   0x4   :  { %201 = vmatprep.subr.bf16.mxu0 %v3449_v4  ;;  %v3482_v10 = vld [vmem:[%s4258_s1 + $0x48] ss:$12 sps:$4 sm:$0xff]   ;;  %2972 = vmatpush3.bf16.msra.mxu1 %v3154_v9  ;;  %v3488_v11 = vld [vmem:[%s4258_s1 + $0x64] ss:$12 sps:$4 sm:$0xff]   ;;  %v3158_v12 = vld [vmem:[%s4258_s1 + $0x20] ss:$12 sps:$4 sm:$0xff]  }
   0x5   :  { %2973 = vmatprep.subr.bf16.mxu1 %v3407_v1  ;;  %v3497_v13 = vld [vmem:[%s4258_s1 + $0x60] ss:$12 sps:$4 sm:$0xff]   ;;  %v3160_v14 = vld [vmem:[%s4258_s1 + $0x38] ss:$12 sps:$4 sm:$0xff]   ;;  %v3507_v15 = vld [vmem:[%s4258_s1 + $0x7c] ss:$12 sps:$4 sm:$0xff]  }
   0x6   :  { %v3513_v16 = vld [vmem:[%s4258_s1 + $0x78] ss:$12 sps:$4 sm:$0xff]   ;;  %v3519_v17 = vld [vmem:[%s4258_s1 + $0x94] ss:$12 sps:$4 sm:$0xff]   ;;  %v3161_v18 = vld [vmem:[%s4258_s1 + $0x50] ss:$12 sps:$4 sm:$0xff]  }
   0x7   :  { %202 = vmatpush1.bf16.msra.mxu0 %v3455_v5  ;;  %v3529_v19 = vld [vmem:[%s4258_s1 + $0x90] ss:$12 sps:$4 sm:$0xff]   ;;  %v3162_v20 = vld [vmem:[%s4258_s1 + $0x68] ss:$12 sps:$4 sm:$0xff]   ;;  %v3537_v21 = vld [vmem:[%s4258_s1 + $0xac] ss:$12 sps:$4 sm:$0xff]  }
   0x8   :  { %203 = vmatprep.subr.bf16.mxu0 %v3461_v6  ;;  %2974 = vmatpush3.bf16.msra.mxu1 %v3158_v12  ;;  %v3545_v22 = vld [vmem:[%s4258_s1 + $0xa8] ss:$12 sps:$4 sm:$0xff]   ;;  %v3547_v23 = vld [vmem:[#allocation2] sm:$0x3]  ;;  %v3164_v25 = vld [vmem:[%s4258_s1 + $0x98] ss:$12 sps:$4 sm:$0xff]  }
   0x9   :  { %2975 = vmatprep.subr.bf16.mxu1 %v3407_v1  ;;  %v3163_v24 = vld [vmem:[%s4258_s1 + $0x80] ss:$12 sps:$4 sm:$0xff]   ;;  %v38_v26 = vpack.c.bf16 %v3547_v23, %v3547_v23  ;;  %v3165_v27 = vld [vmem:[%s4258_s1 + $0xb0] ss:$12 sps:$4 sm:$0xff]   ;;  %v3166_v28 = vld [vmem:[%s4258_s1 + $0x8] ss:$12 sps:$4 sm:$0xff]  }
   0xa   :  { %v3167_v29 = vld [vmem:[%s4258_s1 + $0x20] ss:$12 sps:$4 sm:$0xff]   ;;  %v3168_v30 = vld [vmem:[%s4258_s1 + $0x38] ss:$12 sps:$4 sm:$0xff]   ;;  %v3169_v31 = vld [vmem:[%s4258_s1 + $0x50] ss:$12 sps:$4 sm:$0xff]  }
   0xb   :  { %204 = vmatpush1.bf16.msra.mxu0 %v3467_v7  ;;  %v3170_v32 = vld [vmem:[%s4258_s1 + $0x68] ss:$12 sps:$4 sm:$0xff]   ;;  %v3171_v33 = vld [vmem:[%s4258_s1 + $0x80] ss:$12 sps:$4 sm:$0xff]   ;;  %v3172_v34 = vld [vmem:[%s4258_s1 + $0x98] ss:$12 sps:$4 sm:$0xff]  }
   0xc   :  { %205 = vmatprep.subr.bf16.mxu0 %v3473_v8  ;;  %2976 = vmatpush3.bf16.msra.mxu1 %v3160_v14  ;;  %v3173_v35 = vld [vmem:[%s4258_s1 + $0xb0] ss:$12 sps:$4 sm:$0xff]   ;;  %v28_v36 = vld [vmem:[%s4259_s0] sm:$0x11]  ;;  %v29_v14 = vld [vmem:[%s4259_s0 + $0x8] sm:$0x1] }
   0xd   :  { %2977 = vmatprep.subr.bf16.mxu1 %v3407_v1  ;;  %v30_v37 = vld [vmem:[%s4259_s0 + $0xc] sm:$0x11]  ;;  %v32_v38 = vunpack.c.l.bf16 %v28_v36  ;;  %v33_v52 = vunpack.c.h.bf16 %v28_v36  ;;  %v3628_v63 = vld [vmem:[%s4260_s2] ss:$0 sm:$0xff] }
   0xe   :  { %v35_v39 = vunpack.c.l.bf16 %v30_v37  ;;  %v36_v54 = vunpack.c.h.bf16 %v30_v37 }
   0xf   :  { %206 = vmatpush1.bf16.msra.mxu0 %v3482_v10 }
  0x10   :  { %207 = vmatprep.subr.bf16.mxu0 %v3488_v11  ;;  %2978 = vmatpush3.bf16.msra.mxu1 %v3161_v18  ;;  %v31_v18 = vld [vmem:[%s4259_s0 + $0x14] sm:$0x1] }
  0x11   :  { %2979 = vmatprep.subr.bf16.mxu1 %v3407_v1 }
  0x13   :  { %208 = vmatpush1.bf16.msra.mxu0 %v3497_v13 }
  0x14   :  { %209 = vmatprep.subr.bf16.mxu0 %v3507_v15  ;;  %2980 = vmatpush3.bf16.msra.mxu1 %v3162_v20 }
  0x15   :  { %2981 = vmatprep.subr.bf16.mxu1 %v3407_v1 }
  0x17   :  { %210 = vmatpush1.bf16.msra.mxu0 %v3513_v16 }
  0x18   :  { %211 = vmatprep.subr.bf16.mxu0 %v3519_v17  ;;  %2982 = vmatpush3.bf16.msra.mxu1 %v3163_v24 }
  0x19   :  { %2983 = vmatprep.subr.bf16.mxu1 %v3407_v1 }
  0x1b   :  { %212 = vmatpush1.bf16.msra.mxu0 %v3529_v19 }
  0x1c   :  { %213 = vmatprep.subr.bf16.mxu0 %v3537_v21  ;;  %2984 = vmatpush3.bf16.msra.mxu1 %v3164_v25  ;;  %v34_v25 = vunpack.c.l.bf16 %v29_v14 }
  0x1d   :  { %2985 = vmatprep.subr.bf16.mxu1 %v3407_v1 }
  0x1f   :  { %214 = vmatpush1.bf16.msra.mxu0 %v3545_v22 }
  0x20   :  { %524 = vmatprep.subr.bf16.mxu0 %v3433_v0  ;;  %2986 = vmatpush3.bf16.msra.mxu1 %v3165_v27 }
  0x21   :  { %2991 = vmatprep.subr.bf16.mxu1 %v3407_v1 }
  0x22   :  { %232 = vmatmul.mubr.bf16.vlgmr.msra.gmra.mrb[0].mxu0 %v38_v26 }
  0x23   :  { %525 = vmatpush1.bf16.msra.mxu0 %v3441_v3  ;;  %556 = vmatprep.mubr.bf16.mxu0 %v3408_v2 }
  0x24   :  { %526 = vmatprep.subr.bf16.mxu0 %v3449_v4  ;;  %2988 = vmatmul.mubr.bf16.vlgmr.msra.gmra.mrb[0].mxu1 %v38_v26  ;;  %v37_v26 = vunpack.c.l.bf16 %v31_v18 }
  0x25   :  { %3007 = vmatprep.mubr.msk.bf16.mxu1 %vm3409_vm0, %v3407_v1  ;;  %2992 = vmatpush3.bf16.msra.mxu1 %v3166_v28 }
  0x26   :  { %2993 = vmatprep.subr.bf16.mxu1 %v3407_v1 }
  0x27   :  { %527 = vmatpush1.bf16.msra.mxu0 %v3455_v5 }
  0x28   :  { %528 = vmatprep.subr.bf16.mxu0 %v3461_v6 }
  0x29   :  { %2994 = vmatpush3.bf16.msra.mxu1 %v3167_v29 }
  0x2a   :  { %2995 = vmatprep.subr.bf16.mxu1 %v3407_v1 }
  0x2b   :  { %529 = vmatpush1.bf16.msra.mxu0 %v3467_v7 }
  0x2c   :  { %530 = vmatprep.subr.bf16.mxu0 %v3473_v8 }
  0x2d   :  { %2996 = vmatpush3.bf16.msra.mxu1 %v3168_v30 }
  0x2e   :  { %2997 = vmatprep.subr.bf16.mxu1 %v3407_v1 }
  0x2f   :  { %531 = vmatpush1.bf16.msra.mxu0 %v3482_v10 }
  0x30   :  { %532 = vmatprep.subr.bf16.mxu0 %v3488_v11 }
  0x31   :  { %2998 = vmatpush3.bf16.msra.mxu1 %v3169_v31 }
  0x32   :  { %2999 = vmatprep.subr.bf16.mxu1 %v3407_v1 }
  0x33   :  { %533 = vmatpush1.bf16.msra.mxu0 %v3497_v13 }
  0x34   :  { %534 = vmatprep.subr.bf16.mxu0 %v3507_v15 }
  0x35   :  { %3000 = vmatpush3.bf16.msra.mxu1 %v3170_v32 }
  0x36   :  { %3001 = vmatprep.subr.bf16.mxu1 %v3407_v1 }
  0x37   :  { %535 = vmatpush1.bf16.msra.mxu0 %v3513_v16 }
  0x38   :  { %536 = vmatprep.subr.bf16.mxu0 %v3519_v17 }
  0x39   :  { %3002 = vmatpush3.bf16.msra.mxu1 %v3171_v33 }
  0x3a   :  { %3003 = vmatprep.subr.bf16.mxu1 %v3407_v1 }
  0x3b   :  { %537 = vmatpush1.bf16.msra.mxu0 %v3529_v19 }
  0x3c   :  { %538 = vmatprep.subr.bf16.mxu0 %v3537_v21 }
  0x3d   :  { %3004 = vmatpush3.bf16.msra.mxu1 %v3172_v34 }
  0x3e   :  { %3005 = vmatprep.subr.bf16.mxu1 %v3407_v1 }
  0x3f   :  { %539 = vmatpush1.bf16.msra.mxu0 %v3545_v22 }
  0x40   :  { %852 = vmatprep.subr.bf16.mxu0 %v3433_v0 }
  0x41   :  { %3006 = vmatpush3.bf16.msra.mxu1 %v3173_v35 }
  0x42   :  { %3011 = vmatprep.subr.bf16.mxu1 %v3407_v1 }
  0xf5   :  { %v233_v40 = vpop.f32.mrb[0].mxu0 }
  0xf6   :  { %v281_v41 = vrot.slane %v233_v40, 1  ;;  %v284_v42 = vadd.f32 %v233_v40, %v32_v38  ;;  %v235_v43 = vpop.f32.mrb[1].mxu0 }
  0xf7   :  { %v237_v44 = vpop.f32.mrb[2].mxu0  ;;  %v274_v49 = vpop.f32.mrb[0].mxu1  ;;  %v299_v55 = vrot.slane %v235_v43, 1  ;;  %v302_v57 = vadd.f32 %v235_v43, %v33_v52 }
  0xf8   :  { %v285_v45 = vadd.f32 %v281_v41, %v35_v39  ;;  %v2699_v46 = vmul.f32 -1.442695, %v284_v42  ;;  %v238_v47 = vpop.f32.mrb[3].mxu0  ;;  %v2989_v50 = vpop.f32.mrb[1].mxu1  ;;  %v316_v12 = vadd.f32 %v3628_v63, %v274_v49 }
  0xf9   :  { %v277_v51 = vpop.f32.mrb[2].mxu1  ;;  %v303_v60 = vadd.f32 %v299_v55, %v36_v54  ;;  %v2701_v62 = vmul.f32 -1.442695, %v302_v57  ;;  %v3174_v54 = vld [vmem:[%s4258_s1 + $0x8] ss:$12 sps:$4 sm:$0xff]  }
  0xfa   :  { %3246 = vpow2.f32 %v2699_v46  ;;  %v2700_v48 = vmul.f32 -1.442695, %v285_v45  ;;  %v2990_v53 = vpop.f32.mrb[3].mxu1  ;;  %v318_v20 = vrot.slane %v316_v12, 1  ;;  %v3175_v55 = vld [vmem:[%s4258_s1 + $0x20] ss:$12 sps:$4 sm:$0xff]  }
  0xfb   :  { %v2702_v9 = vmul.f32 -1.442695, %v303_v60  ;;  %v3178_v57 = vld [vmem:[%s4258_s1 + $0x68] ss:$12 sps:$4 sm:$0xff]   ;;  %v3181_v60 = vld [vmem:[%s4258_s1 + $0xb0] ss:$12 sps:$4 sm:$0xff]  }
  0xfc   :  { %3248 = vpow2.f32 %v2700_v48 }
 0x104   :  { %v3247_v56 = vpop.eup %3246 }
 0x105   :  { %v292_v58 = vadd.f32 1.0, %v3247_v56  ;;  %v3176_v56 = vld [vmem:[%s4258_s1 + $0x38] ss:$12 sps:$4 sm:$0xff]  }
 0x106   :  { %v3249_v59 = vpop.eup %3248 }
 0x107   :  { %v293_v61 = vadd.f32 1.0, %v3249_v59  ;;  %3250 = vrcp.f32 %v292_v58  ;;  %v3179_v58 = vld [vmem:[%s4258_s1 + $0x80] ss:$12 sps:$4 sm:$0xff]   ;;  %v3180_v59 = vld [vmem:[%s4258_s1 + $0x98] ss:$12 sps:$4 sm:$0xff]  }
 0x109   :  { %3252 = vrcp.f32 %v293_v61  ;;  %v346_v61 = vld [vmem:[%s4259_s0 + $0xc] sm:$0x11] }
 0x10a   :  { %3254 = vpow2.f32 %v2701_v62  ;;  %v344_v62 = vld [vmem:[%s4259_s0] sm:$0x11] }
 0x10b   :  { %3256 = vpow2.f32 %v2702_v9  ;;  %v351_v9 = vunpack.c.l.bf16 %v346_v61 }
 0x111   :  { %v3251_v24 = vpop.eup %3250 }
 0x112   :  { %v321_v27 = vmul.f32 %v3251_v24, %v316_v12  ;;  %v348_v12 = vunpack.c.l.bf16 %v344_v62 }
 0x113   :  { %v3253_v28 = vpop.eup %3252 }
 0x114   :  { %v322_v29 = vmul.f32 %v3253_v28, %v318_v20  ;;  %v3255_v30 = vpop.eup %3254  ;;  %v323_v31 = vadd.f32 %v321_v27, %v34_v25 }
 0x115   :  { %v3257_v33 = vpop.eup %3256  ;;  %v310_v34 = vadd.f32 1.0, %v3255_v30 }
 0x116   :  { %v324_v32 = vadd.f32 %v322_v29, %v37_v26  ;;  %v311_v35 = vadd.f32 1.0, %v3257_v33 }
 0x118   :  { %3258 = vtanh.f32 %v324_v32 }
 0x119   :  { %3260 = vtanh.f32 %v323_v31 }
 0x11a   :  { %3262 = vrcp.f32 %v310_v34  ;;  %v352_v34 = vunpack.c.h.bf16 %v346_v61 }
 0x11b   :  { %3264 = vrcp.f32 %v311_v35  ;;  %v349_v35 = vunpack.c.h.bf16 %v344_v62 }
 0x122   :  { %v3259_v36 = vpop.eup %3258 }
 0x123   :  { %v329_v37 = vrot.slane %v3259_v36, 7  ;;  %v3261_v38 = vpop.eup %3260 }
 0x124   :  { %v3263_v41 = vpop.eup %3262 }
 0x125   :  { %v331_v39 = vsel %vm330_vm1, %v329_v37, %v3261_v38  ;;  %v3265_v44 = vpop.eup %3264 }
 0x126   :  { %v333_v40 = vsub.f32 %v3547_v23, %v331_v39 }
 0x128   :  { %v338_v42 = vmul.f32 %v3263_v41, %v333_v40  ;;  %v335_v43 = vrot.slane %v333_v40, 1 }
 0x12a   :  { %v3639_v45 = vadd.f32 %v3261_v38, %v338_v42  ;;  %v339_v46 = vmul.f32 %v3265_v44, %v335_v43 }
 0x12c   :  { %342 = vst [vmem:[%s4261_s3] sm:$0x1] %v3639_v45  ;;  %v3645_v47 = vadd.f32 %v3259_v36, %v339_v46  ;;  %v354_v23 = vpack.c.bf16 %v3639_v45, %v3639_v45  ;;  %v347_v46 = vld [vmem:[%s4259_s0 + $0x14] sm:$0x1] }
 0x12e   :  { %343 = vst [vmem:[%s4261_s3 + $0x8] sm:$0x1] %v3645_v47  ;;  %v355_v48 = vpack.c.bf16 %v3645_v47, %v3645_v47  ;;  %v390_v50 = vunpack.c.l.b16 %v354_v23 }
 0x130   :  { %v391_v49 = vunpack.c.l.b16 %v355_v48  ;;  %v345_v48 = vld [vmem:[%s4259_s0 + $0x8] sm:$0x1] }
 0x132   :  { %v392_v51 = vrot.slane %v391_v49, 7  ;;  %v353_v49 = vunpack.c.l.bf16 %v347_v46 }
 0x134   :  { %v393_v52 = vsel %vm330_vm1, %v392_v51, %v390_v50  ;;  %v350_v51 = vunpack.c.l.bf16 %v345_v48 }
 0x135   :  { %v394_v53 = vpack.c.b16 %v393_v52, %v393_v52 }
 0x137   :  { %557 = vmatmul.mubr.bf16.vlgmr.msra.gmra.mrb[4].mxu0 %v394_v53  ;;  %3008 = vmatmul.mubr.bf16.vlgmr.msra.gmra.mrb[4].mxu1 %v394_v53 }
 0x138   :  { %853 = vmatpush1.bf16.msra.mxu0 %v3441_v3  ;;  %884 = vmatprep.mubr.bf16.mxu0 %v3408_v2 }
 0x139   :  { %854 = vmatprep.subr.bf16.mxu0 %v3449_v4  ;;  %3027 = vmatprep.mubr.msk.bf16.mxu1 %vm3409_vm0, %v3407_v1 }
 0x13a   :  { %3012 = vmatpush3.bf16.msra.mxu1 %v3174_v54 }
 0x13b   :  { %3013 = vmatprep.subr.bf16.mxu1 %v3407_v1 }
 0x13c   :  { %855 = vmatpush1.bf16.msra.mxu0 %v3455_v5 }
 0x13d   :  { %856 = vmatprep.subr.bf16.mxu0 %v3461_v6 }
 0x13e   :  { %3014 = vmatpush3.bf16.msra.mxu1 %v3175_v55 }
 0x13f   :  { %3015 = vmatprep.subr.bf16.mxu1 %v3407_v1 }
 0x140   :  { %857 = vmatpush1.bf16.msra.mxu0 %v3467_v7 }
 0x141   :  { %858 = vmatprep.subr.bf16.mxu0 %v3473_v8 }
 0x142   :  { %3016 = vmatpush3.bf16.msra.mxu1 %v3176_v56 }
 0x143   :  { %3017 = vmatprep.subr.bf16.mxu1 %v3407_v1 }
 0x144   :  { %859 = vmatpush1.bf16.msra.mxu0 %v3482_v10 }
 0x145   :  { %860 = vmatprep.subr.bf16.mxu0 %v3488_v11 }
 0x148   :  { %861 = vmatpush1.bf16.msra.mxu0 %v3497_v13 }
 0x149   :  { %862 = vmatprep.subr.bf16.mxu0 %v3507_v15 }
 0x14c   :  { %863 = vmatpush1.bf16.msra.mxu0 %v3513_v16 }
 0x14d   :  { %864 = vmatprep.subr.bf16.mxu0 %v3519_v17 }
 0x150   :  { %865 = vmatpush1.bf16.msra.mxu0 %v3529_v19 }
 0x151   :  { %866 = vmatprep.subr.bf16.mxu0 %v3537_v21 }
 0x154   :  { %867 = vmatpush1.bf16.msra.mxu0 %v3545_v22 }
 0x155   :  { %1184 = vmatprep.subr.bf16.mxu0 %v3433_v0  ;;  %v3177_v0 = vld [vmem:[%s4258_s1 + $0x50] ss:$12 sps:$4 sm:$0xff]  }
 0x156   :  { %3018 = vmatpush3.bf16.msra.mxu1 %v3177_v0 }
 0x157   :  { %3019 = vmatprep.subr.bf16.mxu1 %v3407_v1 }
 0x15a   :  { %3020 = vmatpush3.bf16.msra.mxu1 %v3178_v57 }
 0x15b   :  { %3021 = vmatprep.subr.bf16.mxu1 %v3407_v1 }
 0x15e   :  { %3022 = vmatpush3.bf16.msra.mxu1 %v3179_v58 }
 0x15f   :  { %3023 = vmatprep.subr.bf16.mxu1 %v3407_v1 }
 0x162   :  { %3024 = vmatpush3.bf16.msra.mxu1 %v3180_v59 }
 0x163   :  { %3025 = vmatprep.subr.bf16.mxu1 %v3407_v1 }
 0x166   :  { %3026 = vmatpush3.bf16.msra.mxu1 %v3181_v60 }
 0x167   :  { %3031 = vmatprep.subr.bf16.mxu1 %v3407_v1 }
 0x20a   :  { %v558_v14 = vpop.f32.mrb[4].mxu0  ;;  %v599_v18 = vpop.f32.mrb[4].mxu1 }
 0x20b   :  { %v606_v20 = vrot.slane %v558_v14, 7  ;;  %v610_v24 = vadd.f32 %v558_v14, %v351_v9  ;;  %v560_v25 = vpop.f32.mrb[5].mxu0  ;;  %v3009_v26 = vpop.f32.mrb[5].mxu1  ;;  %v641_v23 = vadd.f32 %v3628_v63, %v599_v18 }
 0x20c   :  { %v562_v27 = vpop.f32.mrb[6].mxu0  ;;  %v602_v28 = vpop.f32.mrb[6].mxu1  ;;  %v624_v36 = vrot.slane %v560_v25, 7  ;;  %v628_v37 = vadd.f32 %v560_v25, %v352_v34 }
 0x20d   :  { %v609_v29 = vadd.f32 %v606_v20, %v348_v12  ;;  %v2728_v30 = vmul.f32 -1.442695, %v610_v24  ;;  %v563_v31 = vpop.f32.mrb[7].mxu0  ;;  %v3010_v32 = vpop.f32.mrb[7].mxu1  ;;  %v643_v52 = vrot.slane %v641_v23, 7 }
 0x20e   :  { %v627_v40 = vadd.f32 %v624_v36, %v349_v35  ;;  %v2730_v43 = vmul.f32 -1.442695, %v628_v37 }
 0x20f   :  { %v2727_v33 = vmul.f32 -1.442695, %v609_v29  ;;  %3266 = vpow2.f32 %v2728_v30 }
 0x210   :  { %v2729_v44 = vmul.f32 -1.442695, %v627_v40 }
 0x211   :  { %3268 = vpow2.f32 %v2727_v33 }
 0x219   :  { %v3267_v38 = vpop.eup %3266 }
 0x21a   :  { %v618_v39 = vadd.f32 1.0, %v3267_v38 }
 0x21b   :  { %v3269_v41 = vpop.eup %3268 }
 0x21c   :  { %v617_v42 = vadd.f32 1.0, %v3269_v41  ;;  %3270 = vrcp.f32 %v618_v39 }
 0x21e   :  { %3272 = vrcp.f32 %v617_v42 }
 0x21f   :  { %3274 = vpow2.f32 %v2730_v43 }
 0x220   :  { %3276 = vpow2.f32 %v2729_v44 }
 0x226   :  { %v3271_v50 = vpop.eup %3270 }
 0x227   :  { %v647_v53 = vmul.f32 %v3271_v50, %v641_v23 }
 0x228   :  { %v3273_v54 = vpop.eup %3272 }
 0x229   :  { %v646_v55 = vmul.f32 %v3273_v54, %v643_v52  ;;  %v649_v56 = vadd.f32 %v647_v53, %v353_v49  ;;  %v3275_v0 = vpop.eup %3274 }
 0x22a   :  { %v3277_v58 = vpop.eup %3276  ;;  %v636_v59 = vadd.f32 1.0, %v3275_v0 }
 0x22b   :  { %v648_v57 = vadd.f32 %v646_v55, %v350_v51  ;;  %3278 = vtanh.f32 %v649_v56  ;;  %v635_v60 = vadd.f32 1.0, %v3277_v58 }
 0x22d   :  { %3280 = vtanh.f32 %v648_v57 }
 0x22e   :  { %3282 = vrcp.f32 %v636_v59 }
 0x22f   :  { %3284 = vrcp.f32 %v635_v60  ;;  %v673_v60 = vld [vmem:[%s4259_s0 + $0x8] sm:$0x2] }
 0x235   :  { %v3279_v61 = vpop.eup %3278 }
 0x236   :  { %v655_v62 = vrot.slane %v3279_v61, 1 }
 0x237   :  { %v3281_v9 = vpop.eup %3280 }
 0x238   :  { %v654_v12 = vrot.slane %v3281_v9, 1  ;;  %v659_v14 = vsub.f32 %v3645_v47, %v655_v62  ;;  %v3283_v24 = vpop.eup %3282  ;;  %v678_v62 = vunpack.c.l.bf16 %v673_v60  ;;  %v3221_v60 = vld [vmem:[%s4258_s1 + $0xb0] ss:$12 sps:$4 sm:$0xff]  }
 0x239   :  { %v3285_v27 = vpop.eup %3284 }
 0x23a   :  { %v658_v18 = vsub.f32 %v3639_v45, %v654_v12  ;;  %v663_v20 = vrot.slane %v659_v14, 7 }
 0x23c   :  { %v662_v25 = vrot.slane %v658_v18, 7  ;;  %v667_v26 = vmul.f32 %v3283_v24, %v663_v20 }
 0x23e   :  { %v666_v28 = vmul.f32 %v3285_v27, %v662_v25  ;;  %v3722_v29 = vadd.f32 %v3279_v61, %v667_v26  ;;  %v675_v61 = vld [vmem:[%s4259_s0 + $0x14] sm:$0x2] }
 0x23f   :  { %v681_v14 = vunpack.c.l.bf16 %v675_v61  ;;  %v1003_v61 = vld [vmem:[%s4259_s0] sm:$0x22] }
 0x240   :  { %v3724_v30 = vadd.f32 %v3281_v9, %v666_v28  ;;  %671 = vst [vmem:[%s4261_s3 + $0x8] sm:$0x2] %v3722_v29  ;;  %v683_v47 = vpack.c.bf16 %v3722_v29, %v3722_v29 }
 0x242   :  { %670 = vst [vmem:[%s4261_s3] sm:$0x2] %v3724_v30  ;;  %v682_v45 = vpack.c.bf16 %v3724_v30, %v3724_v30  ;;  %v719_v32 = vunpack.c.l.b16 %v683_v47 }
 0x244   :  { %v718_v31 = vunpack.c.l.b16 %v682_v45 }
 0x246   :  { %v720_v33 = vrot.slane %v718_v31, 1 }
 0x248   :  { %v721_v34 = vsel %vm330_vm1, %v719_v32, %v720_v33 }
 0x249   :  { %v722_v35 = vpack.c.b16 %v721_v34, %v721_v34 }
 0x24b   :  { %885 = vmatmul.mubr.bf16.vlgmr.msra.gmra.mrb[8].mxu0 %v722_v35  ;;  %3028 = vmatmul.mubr.bf16.vlgmr.msra.gmra.mrb[8].mxu1 %v722_v35 }
 0x24c   :  { %1185 = vmatpush1.bf16.msra.mxu0 %v3441_v3  ;;  %1216 = vmatprep.mubr.bf16.mxu0 %v3408_v2  ;;  %v3182_v3 = vld [vmem:[%s4258_s1 + $0x8] ss:$12 sps:$4 sm:$0xff]  }
 0x24d   :  { %1186 = vmatprep.subr.bf16.mxu0 %v3449_v4  ;;  %3047 = vmatprep.mubr.msk.bf16.mxu1 %vm3409_vm0, %v3407_v1  ;;  %v3183_v4 = vld [vmem:[%s4258_s1 + $0x20] ss:$12 sps:$4 sm:$0xff]  }
 0x24e   :  { %3032 = vmatpush3.bf16.msra.mxu1 %v3182_v3 }
 0x24f   :  { %3033 = vmatprep.subr.bf16.mxu1 %v3407_v1 }
 0x250   :  { %1187 = vmatpush1.bf16.msra.mxu0 %v3455_v5  ;;  %v3184_v5 = vld [vmem:[%s4258_s1 + $0x38] ss:$12 sps:$4 sm:$0xff]  }
 0x251   :  { %1188 = vmatprep.subr.bf16.mxu0 %v3461_v6  ;;  %v3185_v6 = vld [vmem:[%s4258_s1 + $0x50] ss:$12 sps:$4 sm:$0xff]  }
 0x252   :  { %3034 = vmatpush3.bf16.msra.mxu1 %v3183_v4 }
 0x253   :  { %3035 = vmatprep.subr.bf16.mxu1 %v3407_v1 }
 0x254   :  { %1189 = vmatpush1.bf16.msra.mxu0 %v3467_v7  ;;  %v3186_v7 = vld [vmem:[%s4258_s1 + $0x68] ss:$12 sps:$4 sm:$0xff]  }
 0x255   :  { %1190 = vmatprep.subr.bf16.mxu0 %v3473_v8  ;;  %v3187_v8 = vld [vmem:[%s4258_s1 + $0x80] ss:$12 sps:$4 sm:$0xff]  }
 0x256   :  { %3036 = vmatpush3.bf16.msra.mxu1 %v3184_v5 }
 0x257   :  { %3037 = vmatprep.subr.bf16.mxu1 %v3407_v1 }
 0x258   :  { %1191 = vmatpush1.bf16.msra.mxu0 %v3482_v10  ;;  %v3188_v10 = vld [vmem:[%s4258_s1 + $0x98] ss:$12 sps:$4 sm:$0xff]  }
 0x259   :  { %1192 = vmatprep.subr.bf16.mxu0 %v3488_v11  ;;  %v3189_v11 = vld [vmem:[%s4258_s1 + $0xb0] ss:$12 sps:$4 sm:$0xff]  }
 0x25a   :  { %3038 = vmatpush3.bf16.msra.mxu1 %v3185_v6 }
 0x25b   :  { %3039 = vmatprep.subr.bf16.mxu1 %v3407_v1 }
 0x25c   :  { %1193 = vmatpush1.bf16.msra.mxu0 %v3497_v13  ;;  %v672_v13 = vld [vmem:[%s4259_s0] sm:$0x22] }
 0x25d   :  { %1194 = vmatprep.subr.bf16.mxu0 %v3507_v15  ;;  %v674_v15 = vld [vmem:[%s4259_s0 + $0xc] sm:$0x22]  ;;  %v677_v48 = vunpack.c.h.bf16 %v672_v13 }
 0x25e   :  { %3040 = vmatpush3.bf16.msra.mxu1 %v3186_v7  ;;  %v680_v50 = vunpack.c.h.bf16 %v674_v15 }
 0x25f   :  { %3041 = vmatprep.subr.bf16.mxu1 %v3407_v1 }
 0x260   :  { %1195 = vmatpush1.bf16.msra.mxu0 %v3513_v16  ;;  %v676_v16 = vunpack.c.l.bf16 %v672_v13 }
 0x261   :  { %1196 = vmatprep.subr.bf16.mxu0 %v3519_v17  ;;  %v679_v17 = vunpack.c.l.bf16 %v674_v15 }
 0x262   :  { %3042 = vmatpush3.bf16.msra.mxu1 %v3187_v8 }
 0x263   :  { %3043 = vmatprep.subr.bf16.mxu1 %v3407_v1 }
 0x264   :  { %1197 = vmatpush1.bf16.msra.mxu0 %v3529_v19 }
 0x265   :  { %1198 = vmatprep.subr.bf16.mxu0 %v3537_v21 }
 0x266   :  { %3044 = vmatpush3.bf16.msra.mxu1 %v3188_v10 }
 0x267   :  { %3045 = vmatprep.subr.bf16.mxu1 %v3407_v1 }
 0x268   :  { %1199 = vmatpush1.bf16.msra.mxu0 %v3545_v22 }
 0x26a   :  { %3046 = vmatpush3.bf16.msra.mxu1 %v3189_v11 }
 0x26b   :  { %3051 = vmatprep.subr.bf16.mxu1 %v3407_v1 }
 0x31e   :  { %v886_v19 = vpop.f32.mrb[8].mxu0  ;;  %v927_v21 = vpop.f32.mrb[8].mxu1 }
 0x31f   :  { %v934_v22 = vrot.slane %v886_v19, 6  ;;  %v935_v36 = vrot.slane %v886_v19, 7  ;;  %v888_v37 = vpop.f32.mrb[9].mxu0  ;;  %v3029_v38 = vpop.f32.mrb[9].mxu1  ;;  %v971_v59 = vadd.f32 %v3628_v63, %v927_v21 }
 0x320   :  { %v890_v39 = vpop.f32.mrb[10].mxu0  ;;  %v930_v40 = vpop.f32.mrb[10].mxu1  ;;  %v953_v49 = vrot.slane %v888_v37, 6  ;;  %v954_v51 = vrot.slane %v888_v37, 7  ;;  %v3827_v37 = vld [vmem:[%s4258_s1 + $0x4] ss:$12 sps:$4 sm:$0xff]  }
 0x321   :  { %v938_v41 = vadd.f32 %v934_v22, %v676_v16  ;;  %v939_v42 = vadd.f32 %v935_v36, %v679_v17  ;;  %v891_v43 = vpop.f32.mrb[11].mxu0  ;;  %v3030_v44 = vpop.f32.mrb[11].mxu1  ;;  %v973_v9 = vrot.slane %v971_v59, 6  ;;  %v974_v18 = vrot.slane %v971_v59, 7  ;;  %v3832_v38 = vld [vmem:[%s4258_s1] ss:$12 sps:$4 sm:$0xff]   ;;  %1516 = vmatprep.subr.bf16.mxu0 %v3827_v37 }
 0x322   :  { %v957_v52 = vadd.f32 %v953_v49, %v677_v48  ;;  %v958_v54 = vadd.f32 %v954_v51, %v680_v50  ;;  %v3193_v39 = vld [vmem:[%s4258_s1 + $0x8] ss:$12 sps:$4 sm:$0xff]   ;;  %v3864_v44 = vld [vmem:[%s4258_s1 + $0x30] ss:$12 sps:$4 sm:$0xff]   ;;  %v3896_v51 = vld [vmem:[%s4258_s1 + $0x60] ss:$12 sps:$4 sm:$0xff]  }
 0x323   :  { %v2755_v46 = vmul.f32 -1.442695, %v938_v41  ;;  %v2756_v23 = vmul.f32 -1.442695, %v939_v42  ;;  %v3842_v40 = vld [vmem:[%s4258_s1 + $0x1c] ss:$12 sps:$4 sm:$0xff]  }
 0x324   :  { %v2757_v57 = vmul.f32 -1.442695, %v957_v52  ;;  %v2758_v58 = vmul.f32 -1.442695, %v958_v54  ;;  %v3848_v41 = vld [vmem:[%s4258_s1 + $0x18] ss:$12 sps:$4 sm:$0xff]  }
 0x325   :  { %3286 = vpow2.f32 %v2755_v46  ;;  %v3197_v42 = vld [vmem:[%s4258_s1 + $0x20] ss:$12 sps:$4 sm:$0xff]   ;;  %v3201_v46 = vld [vmem:[%s4258_s1 + $0x38] ss:$12 sps:$4 sm:$0xff]   ;;  %v3880_v48 = vld [vmem:[%s4258_s1 + $0x48] ss:$12 sps:$4 sm:$0xff]  }
 0x326   :  { %3288 = vpow2.f32 %v2756_v23  ;;  %v3858_v43 = vld [vmem:[%s4258_s1 + $0x34] ss:$12 sps:$4 sm:$0xff]   ;;  %v3874_v23 = vld [vmem:[%s4258_s1 + $0x4c] ss:$12 sps:$4 sm:$0xff]   ;;  %v3205_v49 = vld [vmem:[%s4258_s1 + $0x50] ss:$12 sps:$4 sm:$0xff]  }
 0x327   :  { %v3890_v50 = vld [vmem:[%s4258_s1 + $0x64] ss:$12 sps:$4 sm:$0xff]   ;;  %v3209_v52 = vld [vmem:[%s4258_s1 + $0x68] ss:$12 sps:$4 sm:$0xff]  }
 0x328   :  { %v3911_v54 = vld [vmem:[%s4258_s1 + $0x7c] ss:$12 sps:$4 sm:$0xff]  }
 0x329   :  { %v3943_v59 = vld [vmem:[%s4258_s1 + $0xa8] ss:$12 sps:$4 sm:$0xff]  }
 0x32f   :  { %v3287_v53 = vpop.eup %3286 }
 0x330   :  { %v3289_v55 = vpop.eup %3288  ;;  %v946_v56 = vadd.f32 1.0, %v3287_v53  ;;  %v3906_v53 = vld [vmem:[%s4258_s1 + $0x78] ss:$12 sps:$4 sm:$0xff]  }
 0x331   :  { %v947_v0 = vadd.f32 1.0, %v3289_v55  ;;  %v3213_v55 = vld [vmem:[%s4258_s1 + $0x80] ss:$12 sps:$4 sm:$0xff]  }
 0x332   :  { %3290 = vrcp.f32 %v946_v56  ;;  %v3920_v56 = vld [vmem:[%s4258_s1 + $0x94] ss:$12 sps:$4 sm:$0xff]  }
 0x333   :  { %3292 = vrcp.f32 %v947_v0  ;;  %v3927_v0 = vld [vmem:[%s4258_s1 + $0x90] ss:$12 sps:$4 sm:$0xff]  }
 0x334   :  { %3294 = vpow2.f32 %v2757_v57  ;;  %v3217_v57 = vld [vmem:[%s4258_s1 + $0x98] ss:$12 sps:$4 sm:$0xff]  }
 0x335   :  { %3296 = vpow2.f32 %v2758_v58  ;;  %v3937_v58 = vld [vmem:[%s4258_s1 + $0xac] ss:$12 sps:$4 sm:$0xff]  }
 0x33c   :  { %v3291_v12 = vpop.eup %3290 }
 0x33d   :  { %v3293_v20 = vpop.eup %3292  ;;  %v977_v24 = vmul.f32 %v3291_v12, %v973_v9  ;;  %v1007_v9 = vunpack.c.l.bf16 %v1003_v61 }
 0x33e   :  { %v978_v25 = vmul.f32 %v3293_v20, %v974_v18  ;;  %v3295_v27 = vpop.eup %3294 }
 0x33f   :  { %v979_v26 = vadd.f32 %v977_v24, %v678_v62  ;;  %v3297_v45 = vpop.eup %3296  ;;  %v965_v47 = vadd.f32 1.0, %v3295_v27  ;;  %v1005_v62 = vld [vmem:[%s4259_s0 + $0xc] sm:$0x22] }
 0x340   :  { %v980_v28 = vadd.f32 %v978_v25, %v681_v14  ;;  %v966_v31 = vadd.f32 1.0, %v3297_v45  ;;  %v1010_v12 = vunpack.c.l.bf16 %v1005_v62 }
 0x341   :  { %3298 = vtanh.f32 %v979_v26 }
 0x342   :  { %3300 = vtanh.f32 %v980_v28 }
 0x343   :  { %3302 = vrcp.f32 %v965_v47 }
 0x344   :  { %3304 = vrcp.f32 %v966_v31 }
 0x34b   :  { %v3299_v32 = vpop.eup %3298 }
 0x34c   :  { %v3301_v33 = vpop.eup %3300  ;;  %v985_v34 = vrot.slane %v3299_v32, 1 }
 0x34d   :  { %v986_v35 = vrot.slane %v3301_v33, 1  ;;  %v3303_v6 = vpop.eup %3302 }
 0x34e   :  { %v989_v3 = vsub.f32 %v3724_v30, %v985_v34  ;;  %v3305_v8 = vpop.eup %3304 }
 0x34f   :  { %v990_v4 = vsub.f32 %v3722_v29, %v986_v35  ;;  %v1008_v35 = vunpack.c.h.bf16 %v1003_v61 }
 0x350   :  { %v993_v5 = vrot.slane %v989_v3, 7 }
 0x351   :  { %v994_v7 = vrot.slane %v990_v4, 7  ;;  %v1011_v4 = vunpack.c.h.bf16 %v1005_v62 }
 0x352   :  { %v997_v10 = vmul.f32 %v3303_v6, %v993_v5 }
 0x353   :  { %v998_v11 = vmul.f32 %v3305_v8, %v994_v7 }
 0x354   :  { %v3804_v13 = vadd.f32 %v3299_v32, %v997_v10 }
 0x355   :  { %v3806_v15 = vadd.f32 %v3301_v33, %v998_v11 }
 0x356   :  { %1001 = vst [vmem:[%s4261_s3] sm:$0x4] %v3804_v13  ;;  %v1013_v30 = vpack.c.bf16 %v3804_v13, %v3804_v13 }
 0x357   :  { %1002 = vst [vmem:[%s4261_s3 + $0x8] sm:$0x4] %v3806_v15  ;;  %v1014_v29 = vpack.c.bf16 %v3806_v15, %v3806_v15 }
 0x358   :  { %v1049_v16 = vunpack.c.l.b16 %v1013_v30 }
 0x359   :  { %v1050_v17 = vunpack.c.l.b16 %v1014_v29 }
 0x35a   :  { %v1051_v19 = vrot.slane %v1049_v16, 2 }
 0x35b   :  { %v1052_v21 = vrot.slane %v1050_v17, 1 }
 0x35d   :  { %v1053_v22 = vsel %vm330_vm1, %v1052_v21, %v1051_v19  ;;  %v1004_v19 = vld [vmem:[%s4259_s0 + $0x8] sm:$0x2]  ;;  %v1006_v21 = vld [vmem:[%s4259_s0 + $0x14] sm:$0x2] }
 0x35e   :  { %v1054_v36 = vpack.c.b16 %v1053_v22, %v1053_v22  ;;  %v1009_v22 = vunpack.c.l.bf16 %v1004_v19  ;;  %v1335_v19 = vld [vmem:[%s4259_s0] sm:$0x44] }
 0x360   :  { %1217 = vmatmul.mubr.bf16.vlgmr.msra.gmra.mrb[12].mxu0 %v1054_v36  ;;  %3048 = vmatmul.mubr.bf16.vlgmr.msra.gmra.mrb[12].mxu1 %v1054_v36 }
 0x361   :  { %1548 = vmatprep.mubr.bf16.mxu0 %v3408_v2  ;;  %3067 = vmatprep.mubr.msk.bf16.mxu1 %vm3409_vm0, %v3407_v1 }
 0x362   :  { %1517 = vmatpush1.bf16.msra.mxu0 %v3832_v38  ;;  %3052 = vmatpush3.bf16.msra.mxu1 %v3193_v39 }
 0x363   :  { %3053 = vmatprep.subr.bf16.mxu1 %v3407_v1  ;;  %1518 = vmatprep.subr.bf16.mxu0 %v3842_v40 }
 0x366   :  { %1519 = vmatpush1.bf16.msra.mxu0 %v3848_v41  ;;  %3054 = vmatpush3.bf16.msra.mxu1 %v3197_v42  ;;  %v1012_v42 = vunpack.c.l.bf16 %v1006_v21  ;;  %v1337_v21 = vld [vmem:[%s4259_s0 + $0xc] sm:$0x44] }
 0x367   :  { %3055 = vmatprep.subr.bf16.mxu1 %v3407_v1  ;;  %1520 = vmatprep.subr.bf16.mxu0 %v3858_v43 }
 0x36a   :  { %1521 = vmatpush1.bf16.msra.mxu0 %v3864_v44  ;;  %3056 = vmatpush3.bf16.msra.mxu1 %v3201_v46 }
 0x36b   :  { %3057 = vmatprep.subr.bf16.mxu1 %v3407_v1  ;;  %1522 = vmatprep.subr.bf16.mxu0 %v3874_v23 }
 0x36e   :  { %1523 = vmatpush1.bf16.msra.mxu0 %v3880_v48  ;;  %3058 = vmatpush3.bf16.msra.mxu1 %v3205_v49 }
 0x36f   :  { %3059 = vmatprep.subr.bf16.mxu1 %v3407_v1  ;;  %1524 = vmatprep.subr.bf16.mxu0 %v3890_v50 }
 0x372   :  { %1525 = vmatpush1.bf16.msra.mxu0 %v3896_v51  ;;  %3060 = vmatpush3.bf16.msra.mxu1 %v3209_v52 }
 0x373   :  { %3061 = vmatprep.subr.bf16.mxu1 %v3407_v1  ;;  %1526 = vmatprep.subr.bf16.mxu0 %v3911_v54 }
 0x376   :  { %1527 = vmatpush1.bf16.msra.mxu0 %v3906_v53  ;;  %3062 = vmatpush3.bf16.msra.mxu1 %v3213_v55 }
 0x377   :  { %1528 = vmatprep.subr.bf16.mxu0 %v3920_v56  ;;  %3063 = vmatprep.subr.bf16.mxu1 %v3407_v1 }
 0x37a   :  { %1529 = vmatpush1.bf16.msra.mxu0 %v3927_v0  ;;  %3064 = vmatpush3.bf16.msra.mxu1 %v3217_v57 }
 0x37b   :  { %1530 = vmatprep.subr.bf16.mxu0 %v3937_v58  ;;  %3065 = vmatprep.subr.bf16.mxu1 %v3407_v1 }
 0x37e   :  { %1531 = vmatpush1.bf16.msra.mxu0 %v3943_v59  ;;  %3066 = vmatpush3.bf16.msra.mxu1 %v3221_v60 }
 0x37f   :  { %1848 = vmatprep.subr.bf16.mxu0 %v3827_v37  ;;  %3071 = vmatprep.subr.bf16.mxu1 %v3407_v1 }
 0x433   :  { %v1218_v14 = vpop.f32.mrb[12].mxu0  ;;  %v1259_v18 = vpop.f32.mrb[12].mxu1 }
 0x434   :  { %v1266_v20 = vrot.slane %v1218_v14, 5  ;;  %v1267_v24 = vrot.slane %v1218_v14, 6  ;;  %v1220_v25 = vpop.f32.mrb[13].mxu0  ;;  %v3049_v26 = vpop.f32.mrb[13].mxu1  ;;  %v1303_v17 = vadd.f32 %v3628_v63, %v1259_v18 }
 0x435   :  { %v1222_v27 = vpop.f32.mrb[14].mxu0  ;;  %v1262_v28 = vpop.f32.mrb[14].mxu1  ;;  %v1285_v3 = vrot.slane %v1220_v25, 5  ;;  %v1286_v5 = vrot.slane %v1220_v25, 6 }
 0x436   :  { %v1270_v45 = vadd.f32 %v1266_v20, %v1007_v9  ;;  %v1271_v47 = vadd.f32 %v1267_v24, %v1010_v12  ;;  %v1223_v31 = vpop.f32.mrb[15].mxu0  ;;  %v3050_v32 = vpop.f32.mrb[15].mxu1  ;;  %v1305_v36 = vrot.slane %v1303_v17, 5  ;;  %v1306_v46 = vrot.slane %v1303_v17, 6  ;;  %v3229_v17 = vld [vmem:[%s4258_s1 + $0xb0] ss:$12 sps:$4 sm:$0xff]  }
 0x437   :  { %v1289_v6 = vadd.f32 %v1285_v3, %v1008_v35  ;;  %v1290_v8 = vadd.f32 %v1286_v5, %v1011_v4 }
 0x438   :  { %v2783_v33 = vmul.f32 -1.442695, %v1270_v45  ;;  %v2784_v34 = vmul.f32 -1.442695, %v1271_v47 }
 0x439   :  { %v2785_v29 = vmul.f32 -1.442695, %v1289_v6  ;;  %v2786_v16 = vmul.f32 -1.442695, %v1290_v8  ;;  %v3223_v8 = vld [vmem:[%s4258_s1 + $0x20] ss:$12 sps:$4 sm:$0xff]  }
 0x43a   :  { %3306 = vpow2.f32 %v2783_v33 }
 0x43b   :  { %3308 = vpow2.f32 %v2784_v34 }
 0x444   :  { %v3307_v7 = vpop.eup %3306 }
 0x445   :  { %v3309_v10 = vpop.eup %3308  ;;  %v1278_v11 = vadd.f32 1.0, %v3307_v7  ;;  %v3222_v7 = vld [vmem:[%s4258_s1 + $0x8] ss:$12 sps:$4 sm:$0xff]  }
 0x446   :  { %v1279_v30 = vadd.f32 1.0, %v3309_v10  ;;  %v3224_v10 = vld [vmem:[%s4258_s1 + $0x38] ss:$12 sps:$4 sm:$0xff]  }
 0x447   :  { %3310 = vrcp.f32 %v1278_v11  ;;  %v3225_v11 = vld [vmem:[%s4258_s1 + $0x50] ss:$12 sps:$4 sm:$0xff]  }
 0x448   :  { %3312 = vrcp.f32 %v1279_v30  ;;  %v3226_v30 = vld [vmem:[%s4258_s1 + $0x68] ss:$12 sps:$4 sm:$0xff]  }
 0x449   :  { %3314 = vpow2.f32 %v2785_v29  ;;  %v3227_v29 = vld [vmem:[%s4258_s1 + $0x80] ss:$12 sps:$4 sm:$0xff]  }
 0x44a   :  { %3316 = vpow2.f32 %v2786_v16  ;;  %v3228_v16 = vld [vmem:[%s4258_s1 + $0x98] ss:$12 sps:$4 sm:$0xff]  }
 0x451   :  { %v3311_v39 = vpop.eup %3310 }
 0x452   :  { %v3313_v49 = vpop.eup %3312  ;;  %v1309_v52 = vmul.f32 %v3311_v39, %v1305_v36  ;;  %v1342_v36 = vunpack.c.l.bf16 %v1337_v21 }
 0x453   :  { %v1310_v55 = vmul.f32 %v3313_v49, %v1306_v46  ;;  %v3315_v60 = vpop.eup %3314 }
 0x454   :  { %v1311_v57 = vadd.f32 %v1309_v52, %v1009_v22  ;;  %v3317_v61 = vpop.eup %3316  ;;  %v1297_v62 = vadd.f32 1.0, %v3315_v60  ;;  %v1339_v22 = vunpack.c.l.bf16 %v1335_v19 }
 0x455   :  { %v1312_v63 = vadd.f32 %v1310_v55, %v1012_v42  ;;  %v1298_v9 = vadd.f32 1.0, %v3317_v61 }
 0x456   :  { %3318 = vtanh.f32 %v1311_v57 }
 0x457   :  { %3320 = vtanh.f32 %v1312_v63 }
 0x458   :  { %3322 = vrcp.f32 %v1297_v62 }
 0x459   :  { %3324 = vrcp.f32 %v1298_v9 }
 0x460   :  { %v3319_v12 = vpop.eup %3318 }
 0x461   :  { %v3321_v14 = vpop.eup %3320  ;;  %v1317_v18 = vrot.slane %v3319_v12, 1 }
 0x462   :  { %v1318_v20 = vrot.slane %v3321_v14, 1  ;;  %v3323_v27 = vpop.eup %3322 }
 0x463   :  { %v1321_v24 = vsub.f32 %v3804_v13, %v1317_v18  ;;  %v3325_v45 = vpop.eup %3324  ;;  %v1340_v18 = vunpack.c.h.bf16 %v1335_v19 }
 0x464   :  { %v1322_v25 = vsub.f32 %v3806_v15, %v1318_v20 }
 0x465   :  { %v1325_v26 = vrot.slane %v1321_v24, 7  ;;  %v1343_v24 = vunpack.c.h.bf16 %v1337_v21 }
 0x466   :  { %v1326_v28 = vrot.slane %v1322_v25, 7 }
 0x467   :  { %v1329_v47 = vmul.f32 %v3323_v27, %v1325_v26 }
 0x468   :  { %v1330_v31 = vmul.f32 %v3325_v45, %v1326_v28 }
 0x469   :  { %v3968_v32 = vadd.f32 %v3319_v12, %v1329_v47 }
 0x46a   :  { %v3970_v33 = vadd.f32 %v3321_v14, %v1330_v31 }
 0x46b   :  { %1333 = vst [vmem:[%s4261_s3] sm:$0x8] %v3968_v32  ;;  %v1345_v13 = vpack.c.bf16 %v3968_v32, %v3968_v32 }
 0x46c   :  { %1334 = vst [vmem:[%s4261_s3 + $0x8] sm:$0x8] %v3970_v33  ;;  %v1346_v15 = vpack.c.bf16 %v3970_v33, %v3970_v33 }
 0x46d   :  { %v1381_v34 = vunpack.c.l.b16 %v1345_v13 }
 0x46e   :  { %v1382_v35 = vunpack.c.l.b16 %v1346_v15 }
 0x46f   :  { %v1383_v3 = vrot.slane %v1381_v34, 3  ;;  %v4045_v34 = vld [vmem:[%s4260_s2] ss:$0 sm:$0xff] }
 0x470   :  { %v1384_v4 = vrot.slane %v1382_v35, 2 }
 0x472   :  { %v1385_v5 = vsel %vm330_vm1, %v1384_v4, %v1383_v3  ;;  %v1336_v3 = vld [vmem:[%s4259_s0 + $0x8] sm:$0x4]  ;;  %v1338_v4 = vld [vmem:[%s4259_s0 + $0x14] sm:$0x4] }
 0x473   :  { %v1386_v6 = vpack.c.b16 %v1385_v5, %v1385_v5  ;;  %v1341_v5 = vunpack.c.l.bf16 %v1336_v3  ;;  %v1667_v3 = vld [vmem:[%s4259_s0] sm:$0x44] }
 0x475   :  { %1549 = vmatmul.mubr.bf16.vlgmr.msra.gmra.mrb[16].mxu0 %v1386_v6  ;;  %3068 = vmatmul.mubr.bf16.vlgmr.msra.gmra.mrb[16].mxu1 %v1386_v6 }
 0x476   :  { %1849 = vmatpush1.bf16.msra.mxu0 %v3832_v38  ;;  %1880 = vmatprep.mubr.bf16.mxu0 %v3408_v2 }
 0x477   :  { %1850 = vmatprep.subr.bf16.mxu0 %v3842_v40  ;;  %3087 = vmatprep.mubr.msk.bf16.mxu1 %vm3409_vm0, %v3407_v1 }
 0x478   :  { %3072 = vmatpush3.bf16.msra.mxu1 %v3222_v7 }
 0x479   :  { %3073 = vmatprep.subr.bf16.mxu1 %v3407_v1 }
 0x47a   :  { %1851 = vmatpush1.bf16.msra.mxu0 %v3848_v41 }
 0x47b   :  { %1852 = vmatprep.subr.bf16.mxu0 %v3858_v43 }
 0x47c   :  { %3074 = vmatpush3.bf16.msra.mxu1 %v3223_v8  ;;  %v1344_v8 = vunpack.c.l.bf16 %v1338_v4  ;;  %v1669_v4 = vld [vmem:[%s4259_s0 + $0xc] sm:$0x44] }
 0x47d   :  { %3075 = vmatprep.subr.bf16.mxu1 %v3407_v1 }
 0x47e   :  { %1853 = vmatpush1.bf16.msra.mxu0 %v3864_v44 }
 0x47f   :  { %1854 = vmatprep.subr.bf16.mxu0 %v3874_v23 }
 0x480   :  { %3076 = vmatpush3.bf16.msra.mxu1 %v3224_v10 }
 0x481   :  { %3077 = vmatprep.subr.bf16.mxu1 %v3407_v1 }
 0x482   :  { %1855 = vmatpush1.bf16.msra.mxu0 %v3880_v48 }
 0x483   :  { %1856 = vmatprep.subr.bf16.mxu0 %v3890_v50 }
 0x484   :  { %3078 = vmatpush3.bf16.msra.mxu1 %v3225_v11 }
 0x485   :  { %3079 = vmatprep.subr.bf16.mxu1 %v3407_v1 }
 0x486   :  { %1857 = vmatpush1.bf16.msra.mxu0 %v3896_v51 }
 0x487   :  { %1858 = vmatprep.subr.bf16.mxu0 %v3911_v54 }
 0x488   :  { %3080 = vmatpush3.bf16.msra.mxu1 %v3226_v30 }
 0x489   :  { %3081 = vmatprep.subr.bf16.mxu1 %v3407_v1 }
 0x48a   :  { %1859 = vmatpush1.bf16.msra.mxu0 %v3906_v53 }
 0x48b   :  { %1860 = vmatprep.subr.bf16.mxu0 %v3920_v56 }
 0x48c   :  { %3082 = vmatpush3.bf16.msra.mxu1 %v3227_v29 }
 0x48d   :  { %3083 = vmatprep.subr.bf16.mxu1 %v3407_v1 }
 0x48e   :  { %1861 = vmatpush1.bf16.msra.mxu0 %v3927_v0 }
 0x48f   :  { %1862 = vmatprep.subr.bf16.mxu0 %v3937_v58 }
 0x490   :  { %3084 = vmatpush3.bf16.msra.mxu1 %v3228_v16 }
 0x491   :  { %3085 = vmatprep.subr.bf16.mxu1 %v3407_v1 }
 0x492   :  { %1863 = vmatpush1.bf16.msra.mxu0 %v3943_v59 }
 0x493   :  { %2180 = vmatprep.subr.bf16.mxu0 %v3827_v37 }
 0x494   :  { %3086 = vmatpush3.bf16.msra.mxu1 %v3229_v17 }
 0x495   :  { %3091 = vmatprep.subr.bf16.mxu1 %v3407_v1 }
 0x548   :  { %v1550_v39 = vpop.f32.mrb[16].mxu0  ;;  %v1591_v42 = vpop.f32.mrb[16].mxu1 }
 0x549   :  { %v1598_v46 = vrot.slane %v1550_v39, 4  ;;  %v1599_v49 = vrot.slane %v1550_v39, 5  ;;  %v1552_v52 = vpop.f32.mrb[17].mxu0  ;;  %v3069_v55 = vpop.f32.mrb[17].mxu1  ;;  %v1635_v35 = vadd.f32 %v4045_v34, %v1591_v42 }
 0x54a   :  { %v1554_v57 = vpop.f32.mrb[18].mxu0  ;;  %v1594_v60 = vpop.f32.mrb[18].mxu1  ;;  %v1617_v20 = vrot.slane %v1552_v52, 4  ;;  %v1618_v25 = vrot.slane %v1552_v52, 5 }
 0x54b   :  { %v1602_v63 = vadd.f32 %v1598_v46, %v1339_v22  ;;  %v1603_v61 = vadd.f32 %v1599_v49, %v1342_v36  ;;  %v1555_v62 = vpop.f32.mrb[19].mxu0  ;;  %v3070_v9 = vpop.f32.mrb[19].mxu1  ;;  %v1637_v6 = vrot.slane %v1635_v35, 4  ;;  %v1638_v10 = vrot.slane %v1635_v35, 5  ;;  %v3237_v35 = vld [vmem:[%s4258_s1 + $0xb0] ss:$12 sps:$4 sm:$0xff]  }
 0x54c   :  { %v1621_v26 = vadd.f32 %v1617_v20, %v1340_v18  ;;  %v1622_v28 = vadd.f32 %v1618_v25, %v1343_v24 }
 0x54d   :  { %v2811_v12 = vmul.f32 -1.442695, %v1602_v63  ;;  %v2812_v14 = vmul.f32 -1.442695, %v1603_v61 }
 0x54e   :  { %v2813_v13 = vmul.f32 -1.442695, %v1621_v26  ;;  %v2814_v15 = vmul.f32 -1.442695, %v1622_v28  ;;  %v3230_v28 = vld [vmem:[%s4258_s1 + $0x8] ss:$12 sps:$4 sm:$0xff]  }
 0x54f   :  { %3326 = vpow2.f32 %v2811_v12 }
 0x550   :  { %3328 = vpow2.f32 %v2812_v14 }
 0x559   :  { %v3327_v27 = vpop.eup %3326 }
 0x55a   :  { %v3329_v45 = vpop.eup %3328  ;;  %v1610_v47 = vadd.f32 1.0, %v3327_v27 }
 0x55b   :  { %v1611_v31 = vadd.f32 1.0, %v3329_v45  ;;  %v3231_v45 = vld [vmem:[%s4258_s1 + $0x20] ss:$12 sps:$4 sm:$0xff]  }
 0x55c   :  { %3330 = vrcp.f32 %v1610_v47  ;;  %v3232_v47 = vld [vmem:[%s4258_s1 + $0x38] ss:$12 sps:$4 sm:$0xff]  }
 0x55d   :  { %3332 = vrcp.f32 %v1611_v31  ;;  %v3234_v31 = vld [vmem:[%s4258_s1 + $0x68] ss:$12 sps:$4 sm:$0xff]  }
 0x55e   :  { %3334 = vpow2.f32 %v2813_v13  ;;  %v3235_v13 = vld [vmem:[%s4258_s1 + $0x80] ss:$12 sps:$4 sm:$0xff]  }
 0x55f   :  { %3336 = vpow2.f32 %v2814_v15  ;;  %v3236_v15 = vld [vmem:[%s4258_s1 + $0x98] ss:$12 sps:$4 sm:$0xff]  }
 0x566   :  { %v3331_v7 = vpop.eup %3330 }
 0x567   :  { %v3333_v11 = vpop.eup %3332  ;;  %v1641_v30 = vmul.f32 %v3331_v7, %v1637_v6  ;;  %v1674_v6 = vunpack.c.l.bf16 %v1669_v4 }
 0x568   :  { %v1642_v29 = vmul.f32 %v3333_v11, %v1638_v10  ;;  %v3335_v17 = vpop.eup %3334 }
 0x569   :  { %v1643_v16 = vadd.f32 %v1641_v30, %v1341_v5  ;;  %v3337_v21 = vpop.eup %3336  ;;  %v1629_v22 = vadd.f32 1.0, %v3335_v17  ;;  %v1671_v5 = vunpack.c.l.bf16 %v1667_v3 }
 0x56a   :  { %v1644_v19 = vadd.f32 %v1642_v29, %v1344_v8  ;;  %v1630_v36 = vadd.f32 1.0, %v3337_v21 }
 0x56b   :  { %3338 = vtanh.f32 %v1643_v16 }
 0x56c   :  { %3340 = vtanh.f32 %v1644_v19 }
 0x56d   :  { %3342 = vrcp.f32 %v1629_v22 }
 0x56e   :  { %3344 = vrcp.f32 %v1630_v36 }
 0x575   :  { %v3339_v39 = vpop.eup %3338 }
 0x576   :  { %v3341_v42 = vpop.eup %3340  ;;  %v1649_v46 = vrot.slane %v3339_v39, 1 }
 0x577   :  { %v1650_v49 = vrot.slane %v3341_v42, 1  ;;  %v3343_v60 = vpop.eup %3342 }
 0x578   :  { %v1653_v52 = vsub.f32 %v3968_v32, %v1649_v46  ;;  %v3345_v61 = vpop.eup %3344  ;;  %v1672_v46 = vunpack.c.h.bf16 %v1667_v3 }
 0x579   :  { %v1654_v55 = vsub.f32 %v3970_v33, %v1650_v49 }
 0x57a   :  { %v1657_v57 = vrot.slane %v1653_v52, 7  ;;  %v1675_v52 = vunpack.c.h.bf16 %v1669_v4 }
 0x57b   :  { %v1658_v63 = vrot.slane %v1654_v55, 7 }
 0x57c   :  { %v1661_v62 = vmul.f32 %v3343_v60, %v1657_v57 }
 0x57d   :  { %v1662_v9 = vmul.f32 %v3345_v61, %v1658_v63 }
 0x57e   :  { %v4056_v12 = vadd.f32 %v3339_v39, %v1661_v62 }
 0x57f   :  { %v4058_v14 = vadd.f32 %v3341_v42, %v1662_v9 }
 0x580   :  { %1665 = vst [vmem:[%s4261_s3] sm:$0x10] %v4056_v12  ;;  %v1677_v32 = vpack.c.bf16 %v4056_v12, %v4056_v12 }
 0x581   :  { %1666 = vst [vmem:[%s4261_s3 + $0x8] sm:$0x10] %v4058_v14  ;;  %v1678_v33 = vpack.c.bf16 %v4058_v14, %v4058_v14 }
 0x582   :  { %v1713_v18 = vunpack.c.l.b16 %v1677_v32 }
 0x583   :  { %v1714_v20 = vunpack.c.l.b16 %v1678_v33 }
 0x584   :  { %v1715_v24 = vrot.slane %v1713_v18, 4 }
 0x585   :  { %v1716_v25 = vrot.slane %v1714_v20, 3  ;;  %v1668_v20 = vld [vmem:[%s4259_s0 + $0x8] sm:$0x4] }
 0x587   :  { %v1717_v26 = vsel %vm330_vm1, %v1716_v25, %v1715_v24  ;;  %v1670_v24 = vld [vmem:[%s4259_s0 + $0x14] sm:$0x4]  ;;  %v1673_v25 = vunpack.c.l.bf16 %v1668_v20 }
 0x588   :  { %v1718_v27 = vpack.c.b16 %v1717_v26, %v1717_v26 }
 0x58a   :  { %1881 = vmatmul.mubr.bf16.vlgmr.msra.gmra.mrb[20].mxu0 %v1718_v27  ;;  %3088 = vmatmul.mubr.bf16.vlgmr.msra.gmra.mrb[20].mxu1 %v1718_v27 }
 0x58b   :  { %2181 = vmatpush1.bf16.msra.mxu0 %v3832_v38  ;;  %2212 = vmatprep.mubr.bf16.mxu0 %v3408_v2 }
 0x58c   :  { %2182 = vmatprep.subr.bf16.mxu0 %v3842_v40  ;;  %3107 = vmatprep.mubr.msk.bf16.mxu1 %vm3409_vm0, %v3407_v1 }
 0x58d   :  { %3092 = vmatpush3.bf16.msra.mxu1 %v3230_v28  ;;  %v1676_v28 = vunpack.c.l.bf16 %v1670_v24 }
 0x58e   :  { %3093 = vmatprep.subr.bf16.mxu1 %v3407_v1 }
 0x58f   :  { %2183 = vmatpush1.bf16.msra.mxu0 %v3848_v41 }
 0x590   :  { %2184 = vmatprep.subr.bf16.mxu0 %v3858_v43 }
 0x591   :  { %3094 = vmatpush3.bf16.msra.mxu1 %v3231_v45 }
 0x592   :  { %3095 = vmatprep.subr.bf16.mxu1 %v3407_v1 }
 0x593   :  { %2185 = vmatpush1.bf16.msra.mxu0 %v3864_v44 }
 0x594   :  { %2186 = vmatprep.subr.bf16.mxu0 %v3874_v23 }
 0x595   :  { %3096 = vmatpush3.bf16.msra.mxu1 %v3232_v47 }
 0x596   :  { %3097 = vmatprep.subr.bf16.mxu1 %v3407_v1 }
 0x597   :  { %2187 = vmatpush1.bf16.msra.mxu0 %v3880_v48 }
 0x598   :  { %2188 = vmatprep.subr.bf16.mxu0 %v3890_v50 }
 0x59b   :  { %2189 = vmatpush1.bf16.msra.mxu0 %v3896_v51 }
 0x59c   :  { %2190 = vmatprep.subr.bf16.mxu0 %v3911_v54 }
 0x59f   :  { %2191 = vmatpush1.bf16.msra.mxu0 %v3906_v53 }
 0x5a0   :  { %2192 = vmatprep.subr.bf16.mxu0 %v3920_v56 }
 0x5a3   :  { %2193 = vmatpush1.bf16.msra.mxu0 %v3927_v0 }
 0x5a4   :  { %2194 = vmatprep.subr.bf16.mxu0 %v3937_v58 }
 0x5a7   :  { %2195 = vmatpush1.bf16.msra.mxu0 %v3943_v59 }
 0x5a8   :  { %2512 = vmatprep.subr.bf16.mxu0 %v3827_v37  ;;  %v3233_v37 = vld [vmem:[%s4258_s1 + $0x50] ss:$12 sps:$4 sm:$0xff]  }
 0x5a9   :  { %3098 = vmatpush3.bf16.msra.mxu1 %v3233_v37 }
 0x5aa   :  { %3099 = vmatprep.subr.bf16.mxu1 %v3407_v1 }
 0x5ad   :  { %3100 = vmatpush3.bf16.msra.mxu1 %v3234_v31 }
 0x5ae   :  { %3101 = vmatprep.subr.bf16.mxu1 %v3407_v1 }
 0x5b1   :  { %3102 = vmatpush3.bf16.msra.mxu1 %v3235_v13 }
 0x5b2   :  { %3103 = vmatprep.subr.bf16.mxu1 %v3407_v1 }
 0x5b5   :  { %3104 = vmatpush3.bf16.msra.mxu1 %v3236_v15 }
 0x5b6   :  { %3105 = vmatprep.subr.bf16.mxu1 %v3407_v1 }
 0x5b9   :  { %3106 = vmatpush3.bf16.msra.mxu1 %v3237_v35 }
 0x5ba   :  { %3111 = vmatprep.subr.bf16.mxu1 %v3407_v1 }
 0x65d   :  { %v1882_v7 = vpop.f32.mrb[20].mxu0  ;;  %v1923_v8 = vpop.f32.mrb[20].mxu1 }
 0x65e   :  { %v1930_v10 = vrot.slane %v1882_v7, 3  ;;  %v1931_v11 = vrot.slane %v1882_v7, 4  ;;  %v1884_v30 = vpop.f32.mrb[21].mxu0  ;;  %v3089_v29 = vpop.f32.mrb[21].mxu1  ;;  %v1967_v18 = vadd.f32 %v4045_v34, %v1923_v8 }
 0x65f   :  { %v1886_v16 = vpop.f32.mrb[22].mxu0  ;;  %v1926_v17 = vpop.f32.mrb[22].mxu1  ;;  %v1949_v49 = vrot.slane %v1884_v30, 3  ;;  %v1950_v55 = vrot.slane %v1884_v30, 4 }
 0x660   :  { %v1934_v19 = vadd.f32 %v1930_v10, %v1671_v5  ;;  %v1935_v21 = vadd.f32 %v1931_v11, %v1674_v6  ;;  %v1887_v22 = vpop.f32.mrb[23].mxu0  ;;  %v3090_v36 = vpop.f32.mrb[23].mxu1  ;;  %v1969_v26 = vrot.slane %v1967_v18, 3  ;;  %v1970_v45 = vrot.slane %v1967_v18, 4 }
 0x661   :  { %v1953_v57 = vadd.f32 %v1949_v49, %v1672_v46  ;;  %v1954_v63 = vadd.f32 %v1950_v55, %v1675_v52 }
 0x662   :  { %v2839_v39 = vmul.f32 -1.442695, %v1934_v19  ;;  %v2840_v42 = vmul.f32 -1.442695, %v1935_v21 }
 0x663   :  { %v2841_v32 = vmul.f32 -1.442695, %v1953_v57  ;;  %v2842_v33 = vmul.f32 -1.442695, %v1954_v63 }
 0x664   :  { %3346 = vpow2.f32 %v2839_v39 }
 0x665   :  { %3348 = vpow2.f32 %v2840_v42 }
 0x66e   :  { %v3347_v60 = vpop.eup %3346 }
 0x66f   :  { %v3349_v61 = vpop.eup %3348  ;;  %v1942_v62 = vadd.f32 1.0, %v3347_v60 }
 0x670   :  { %v1943_v9 = vadd.f32 1.0, %v3349_v61 }
 0x671   :  { %3350 = vrcp.f32 %v1942_v62 }
 0x672   :  { %3352 = vrcp.f32 %v1943_v9 }
 0x673   :  { %3354 = vpow2.f32 %v2841_v32 }
 0x674   :  { %3356 = vpow2.f32 %v2842_v33 }
 0x67b   :  { %v3351_v27 = vpop.eup %3350 }
 0x67c   :  { %v3353_v47 = vpop.eup %3352  ;;  %v1973_v37 = vmul.f32 %v3351_v27, %v1969_v26 }
 0x67d   :  { %v1974_v31 = vmul.f32 %v3353_v47, %v1970_v45  ;;  %v3355_v15 = vpop.eup %3354 }
 0x67e   :  { %v1975_v13 = vadd.f32 %v1973_v37, %v1673_v25  ;;  %v3357_v3 = vpop.eup %3356  ;;  %v1961_v4 = vadd.f32 1.0, %v3355_v15 }
 0x67f   :  { %v1976_v35 = vadd.f32 %v1974_v31, %v1676_v28  ;;  %v1962_v5 = vadd.f32 1.0, %v3357_v3 }
 0x680   :  { %3358 = vtanh.f32 %v1975_v13 }
 0x681   :  { %3360 = vtanh.f32 %v1976_v35 }
 0x682   :  { %3362 = vrcp.f32 %v1961_v4  ;;  %v2000_v4 = vld [vmem:[%s4259_s0 + $0x8] sm:$0x8] }
 0x683   :  { %3364 = vrcp.f32 %v1962_v5  ;;  %v2002_v5 = vld [vmem:[%s4259_s0 + $0x14] sm:$0x8] }
 0x68a   :  { %v3359_v6 = vpop.eup %3358 }
 0x68b   :  { %v3361_v7 = vpop.eup %3360  ;;  %v1981_v8 = vrot.slane %v3359_v6, 1 }
 0x68c   :  { %v1982_v10 = vrot.slane %v3361_v7, 1  ;;  %v3363_v16 = vpop.eup %3362 }
 0x68d   :  { %v1985_v11 = vsub.f32 %v4056_v12, %v1981_v8  ;;  %v3365_v19 = vpop.eup %3364 }
 0x68e   :  { %v1986_v30 = vsub.f32 %v4058_v14, %v1982_v10  ;;  %v2008_v10 = vunpack.c.l.bf16 %v2002_v5 }
 0x68f   :  { %v1989_v29 = vrot.slane %v1985_v11, 7 }
 0x690   :  { %v1990_v17 = vrot.slane %v1986_v30, 7 }
 0x691   :  { %v1993_v21 = vmul.f32 %v3363_v16, %v1989_v29 }
 0x692   :  { %v1994_v22 = vmul.f32 %v3365_v19, %v1990_v17 }
 0x693   :  { %v4139_v36 = vadd.f32 %v3359_v6, %v1993_v21  ;;  %v2005_v6 = vunpack.c.l.bf16 %v2000_v4 }
 0x694   :  { %v4141_v39 = vadd.f32 %v3361_v7, %v1994_v22 }
 0x695   :  { %1997 = vst [vmem:[%s4261_s3] sm:$0x20] %v4139_v36  ;;  %v2009_v12 = vpack.c.bf16 %v4139_v36, %v4139_v36 }
 0x696   :  { %1998 = vst [vmem:[%s4261_s3 + $0x8] sm:$0x20] %v4141_v39  ;;  %v2010_v14 = vpack.c.bf16 %v4141_v39, %v4141_v39 }
 0x697   :  { %v2045_v42 = vunpack.c.l.b16 %v2009_v12 }
 0x698   :  { %v2046_v46 = vunpack.c.l.b16 %v2010_v14 }
 0x699   :  { %v2047_v49 = vrot.slane %v2045_v42, 5 }
 0x69a   :  { %v2048_v52 = vrot.slane %v2046_v46, 4 }
 0x69c   :  { %v2049_v55 = vsel %vm330_vm1, %v2048_v52, %v2047_v49 }
 0x69d   :  { %v2050_v57 = vpack.c.b16 %v2049_v55, %v2049_v55 }
 0x69f   :  { %2213 = vmatmul.mubr.bf16.vlgmr.msra.gmra.mrb[24].mxu0 %v2050_v57  ;;  %3108 = vmatmul.mubr.bf16.vlgmr.msra.gmra.mrb[24].mxu1 %v2050_v57 }
 0x6a0   :  { %2513 = vmatpush1.bf16.msra.mxu0 %v3832_v38  ;;  %2544 = vmatprep.mubr.bf16.mxu0 %v3408_v2  ;;  %v3238_v2 = vld [vmem:[%s4258_s1 + $0x8] ss:$12 sps:$4 sm:$0xff]   ;;  %v3239_v38 = vld [vmem:[%s4258_s1 + $0x20] ss:$12 sps:$4 sm:$0xff]  }
 0x6a1   :  { %2514 = vmatprep.subr.bf16.mxu0 %v3842_v40  ;;  %3127 = vmatprep.mubr.msk.bf16.mxu1 %vm3409_vm0, %v3407_v1  ;;  %v3240_v40 = vld [vmem:[%s4258_s1 + $0x38] ss:$12 sps:$4 sm:$0xff]  }
 0x6a2   :  { %3112 = vmatpush3.bf16.msra.mxu1 %v3238_v2 }
 0x6a3   :  { %3113 = vmatprep.subr.bf16.mxu1 %v3407_v1 }
 0x6a4   :  { %2515 = vmatpush1.bf16.msra.mxu0 %v3848_v41  ;;  %v3241_v41 = vld [vmem:[%s4258_s1 + $0x50] ss:$12 sps:$4 sm:$0xff]  }
 0x6a5   :  { %2516 = vmatprep.subr.bf16.mxu0 %v3858_v43  ;;  %v3242_v43 = vld [vmem:[%s4258_s1 + $0x68] ss:$12 sps:$4 sm:$0xff]  }
 0x6a6   :  { %3114 = vmatpush3.bf16.msra.mxu1 %v3239_v38 }
 0x6a7   :  { %3115 = vmatprep.subr.bf16.mxu1 %v3407_v1 }
 0x6a8   :  { %2517 = vmatpush1.bf16.msra.mxu0 %v3864_v44  ;;  %v3243_v44 = vld [vmem:[%s4258_s1 + $0x80] ss:$12 sps:$4 sm:$0xff]  }
 0x6a9   :  { %2518 = vmatprep.subr.bf16.mxu0 %v3874_v23  ;;  %v3244_v23 = vld [vmem:[%s4258_s1 + $0x98] ss:$12 sps:$4 sm:$0xff]  }
 0x6aa   :  { %3116 = vmatpush3.bf16.msra.mxu1 %v3240_v40 }
 0x6ab   :  { %3117 = vmatprep.subr.bf16.mxu1 %v3407_v1 }
 0x6ac   :  { %2519 = vmatpush1.bf16.msra.mxu0 %v3880_v48  ;;  %v3245_v48 = vld [vmem:[%s4258_s1 + $0xb0] ss:$12 sps:$4 sm:$0xff]  }
 0x6ad   :  { %2520 = vmatprep.subr.bf16.mxu0 %v3890_v50  ;;  %v1999_v50 = vld [vmem:[%s4259_s0] sm:$0x88] }
 0x6ae   :  { %3118 = vmatpush3.bf16.msra.mxu1 %v3241_v41  ;;  %v2004_v24 = vunpack.c.h.bf16 %v1999_v50 }
 0x6af   :  { %3119 = vmatprep.subr.bf16.mxu1 %v3407_v1 }
 0x6b0   :  { %2521 = vmatpush1.bf16.msra.mxu0 %v3896_v51  ;;  %v2001_v51 = vld [vmem:[%s4259_s0 + $0xc] sm:$0x88] }
 0x6b1   :  { %2522 = vmatprep.subr.bf16.mxu0 %v3911_v54  ;;  %v2006_v54 = vunpack.c.l.bf16 %v2001_v51  ;;  %v2007_v26 = vunpack.c.h.bf16 %v2001_v51 }
 0x6b2   :  { %3120 = vmatpush3.bf16.msra.mxu1 %v3242_v43 }
 0x6b3   :  { %3121 = vmatprep.subr.bf16.mxu1 %v3407_v1 }
 0x6b4   :  { %2523 = vmatpush1.bf16.msra.mxu0 %v3906_v53  ;;  %v2003_v53 = vunpack.c.l.bf16 %v1999_v50 }
 0x6b5   :  { %2524 = vmatprep.subr.bf16.mxu0 %v3920_v56 }
 0x6b6   :  { %3122 = vmatpush3.bf16.msra.mxu1 %v3243_v44 }
 0x6b7   :  { %3123 = vmatprep.subr.bf16.mxu1 %v3407_v1 }
 0x6b8   :  { %2525 = vmatpush1.bf16.msra.mxu0 %v3927_v0 }
 0x6b9   :  { %2526 = vmatprep.subr.bf16.mxu0 %v3937_v58 }
 0x6ba   :  { %3124 = vmatpush3.bf16.msra.mxu1 %v3244_v23 }
 0x6bb   :  { %3125 = vmatprep.subr.bf16.mxu1 %v3407_v1 }
 0x6bc   :  { %2527 = vmatpush1.bf16.msra.mxu0 %v3943_v59 }
 0x6be   :  { %3126 = vmatpush3.bf16.msra.mxu1 %v3245_v48 }
 0x772   :  { %v2214_v56 = vpop.f32.mrb[24].mxu0  ;;  %v2255_v0 = vpop.f32.mrb[24].mxu1 }
 0x773   :  { %v2262_v58 = vrot.slane %v2214_v56, 2  ;;  %v2263_v59 = vrot.slane %v2214_v56, 3  ;;  %v2216_v60 = vpop.f32.mrb[25].mxu0  ;;  %v3109_v63 = vpop.f32.mrb[25].mxu1  ;;  %v2299_v3 = vadd.f32 %v4045_v34, %v2255_v0 }
 0x774   :  { %v2218_v61 = vpop.f32.mrb[26].mxu0  ;;  %v2258_v62 = vpop.f32.mrb[26].mxu1  ;;  %v2281_v25 = vrot.slane %v2216_v60, 2  ;;  %v2282_v27 = vrot.slane %v2216_v60, 3 }
 0x775   :  { %v2266_v1 = vadd.f32 %v2262_v58, %v2003_v53  ;;  %v2267_v9 = vadd.f32 %v2263_v59, %v2006_v54  ;;  %v2219_v32 = vpop.f32.mrb[27].mxu0  ;;  %v3110_v33 = vpop.f32.mrb[27].mxu1  ;;  %v2301_v7 = vrot.slane %v2299_v3, 2  ;;  %v2302_v11 = vrot.slane %v2299_v3, 3  ;;  %v2331_v58 = vld [vmem:[%s4259_s0] sm:$0x88] }
 0x776   :  { %v2285_v28 = vadd.f32 %v2281_v25, %v2004_v24  ;;  %v2286_v47 = vadd.f32 %v2282_v27, %v2007_v26  ;;  %v2333_v59 = vld [vmem:[%s4259_s0 + $0xc] sm:$0x88]  ;;  %v2335_v60 = vunpack.c.l.bf16 %v2331_v58 }
 0x777   :  { %v2867_v18 = vmul.f32 -1.442695, %v2266_v1  ;;  %v2868_v20 = vmul.f32 -1.442695, %v2267_v9  ;;  %v2338_v63 = vunpack.c.l.bf16 %v2333_v59 }
 0x778   :  { %v2869_v15 = vmul.f32 -1.442695, %v2285_v28  ;;  %v2870_v35 = vmul.f32 -1.442695, %v2286_v47  ;;  %v2336_v47 = vunpack.c.h.bf16 %v2331_v58 }
 0x779   :  { %3366 = vpow2.f32 %v2867_v18 }
 0x77a   :  { %3368 = vpow2.f32 %v2868_v20 }
 0x783   :  { %v3367_v45 = vpop.eup %3366 }
 0x784   :  { %v3369_v37 = vpop.eup %3368  ;;  %v2274_v31 = vadd.f32 1.0, %v3367_v45 }
 0x785   :  { %v2275_v13 = vadd.f32 1.0, %v3369_v37 }
 0x786   :  { %3370 = vrcp.f32 %v2274_v31  ;;  %v2339_v31 = vunpack.c.h.bf16 %v2333_v59 }
 0x787   :  { %3372 = vrcp.f32 %v2275_v13 }
 0x788   :  { %3374 = vpow2.f32 %v2869_v15 }
 0x789   :  { %3376 = vpow2.f32 %v2870_v35 }
 0x790   :  { %v3371_v8 = vpop.eup %3370 }
 0x791   :  { %v3373_v30 = vpop.eup %3372  ;;  %v2305_v29 = vmul.f32 %v3371_v8, %v2301_v7 }
 0x792   :  { %v2306_v16 = vmul.f32 %v3373_v30, %v2302_v11  ;;  %v3375_v19 = vpop.eup %3374  ;;  %v2332_v11 = vld [vmem:[%s4259_s0 + $0x8] sm:$0x8]  ;;  %v2334_v30 = vld [vmem:[%s4259_s0 + $0x14] sm:$0x8] }
 0x793   :  { %v2307_v17 = vadd.f32 %v2305_v29, %v2005_v6  ;;  %v3377_v22 = vpop.eup %3376  ;;  %v2293_v12 = vadd.f32 1.0, %v3375_v19  ;;  %v2337_v29 = vunpack.c.l.bf16 %v2332_v11  ;;  %v2340_v19 = vunpack.c.l.bf16 %v2334_v30 }
 0x794   :  { %v2308_v21 = vadd.f32 %v2306_v16, %v2008_v10  ;;  %v2294_v14 = vadd.f32 1.0, %v3377_v22 }
 0x795   :  { %3378 = vtanh.f32 %v2307_v17 }
 0x796   :  { %3380 = vtanh.f32 %v2308_v21 }
 0x797   :  { %3382 = vrcp.f32 %v2293_v12 }
 0x798   :  { %3384 = vrcp.f32 %v2294_v14 }
 0x79f   :  { %v3379_v42 = vpop.eup %3378 }
 0x7a0   :  { %v3381_v46 = vpop.eup %3380  ;;  %v2313_v49 = vrot.slane %v3379_v42, 1 }
 0x7a1   :  { %v2314_v52 = vrot.slane %v3381_v46, 1  ;;  %v3383_v38 = vpop.eup %3382 }
 0x7a2   :  { %v2317_v55 = vsub.f32 %v4139_v36, %v2313_v49  ;;  %v3385_v41 = vpop.eup %3384 }
 0x7a3   :  { %v2318_v57 = vsub.f32 %v4141_v39, %v2314_v52 }
 0x7a4   :  { %v2321_v2 = vrot.slane %v2317_v55, 7 }
 0x7a5   :  { %v2322_v40 = vrot.slane %v2318_v57, 7 }
 0x7a6   :  { %v2325_v43 = vmul.f32 %v3383_v38, %v2321_v2 }
 0x7a7   :  { %v2326_v44 = vmul.f32 %v3385_v41, %v2322_v40 }
 0x7a8   :  { %v4220_v23 = vadd.f32 %v3379_v42, %v2325_v43 }
 0x7a9   :  { %v4222_v48 = vadd.f32 %v3381_v46, %v2326_v44 }
 0x7aa   :  { %2329 = vst [vmem:[%s4261_s3] sm:$0x40] %v4220_v23  ;;  %v2341_v36 = vpack.c.bf16 %v4220_v23, %v4220_v23 }
 0x7ab   :  { %2330 = vst [vmem:[%s4261_s3 + $0x8] sm:$0x40] %v4222_v48  ;;  %v2342_v39 = vpack.c.bf16 %v4222_v48, %v4222_v48 }
 0x7ac   :  { %v2377_v50 = vunpack.c.l.b16 %v2341_v36 }
 0x7ad   :  { %v2378_v51 = vunpack.c.l.b16 %v2342_v39 }
 0x7ae   :  { %v2379_v53 = vrot.slane %v2377_v50, 6 }
 0x7af   :  { %v2380_v54 = vrot.slane %v2378_v51, 5 }
 0x7b1   :  { %v2381_v56 = vsel %vm330_vm1, %v2380_v54, %v2379_v53 }
 0x7b2   :  { %v2382_v0 = vpack.c.b16 %v2381_v56, %v2381_v56 }
 0x7b4   :  { %2545 = vmatmul.mubr.bf16.vlgmr.msra.gmra.mrb[28].mxu0 %v2382_v0  ;;  %3128 = vmatmul.mubr.bf16.vlgmr.msra.gmra.mrb[28].mxu1 %v2382_v0 }
 0x887   :  { %v2546_v61 = vpop.f32.mrb[28].mxu0  ;;  %v2587_v62 = vpop.f32.mrb[28].mxu1 }
 0x888   :  { %v2594_v1 = vrot.slane %v2546_v61, 1  ;;  %v2595_v9 = vrot.slane %v2546_v61, 2  ;;  %v2548_v32 = vpop.f32.mrb[29].mxu0  ;;  %v3129_v33 = vpop.f32.mrb[29].mxu1  ;;  %v2631_v10 = vadd.f32 %v4045_v34, %v2587_v62 }
 0x889   :  { %v2550_v18 = vpop.f32.mrb[30].mxu0  ;;  %v2590_v20 = vpop.f32.mrb[30].mxu1  ;;  %v2613_v37 = vrot.slane %v2548_v32, 1  ;;  %v2614_v13 = vrot.slane %v2548_v32, 2 }
 0x88a   :  { %v2598_v24 = vadd.f32 %v2594_v1, %v2335_v60  ;;  %v2599_v25 = vadd.f32 %v2595_v9, %v2338_v63  ;;  %v2551_v26 = vpop.f32.mrb[31].mxu0  ;;  %v3130_v27 = vpop.f32.mrb[31].mxu1  ;;  %v2633_v16 = vrot.slane %v2631_v10, 1  ;;  %v2634_v21 = vrot.slane %v2631_v10, 2 }
 0x88b   :  { %v2617_v15 = vadd.f32 %v2613_v37, %v2336_v47  ;;  %v2618_v3 = vadd.f32 %v2614_v13, %v2339_v31 }
 0x88c   :  { %v2895_v28 = vmul.f32 -1.442695, %v2598_v24  ;;  %v2896_v45 = vmul.f32 -1.442695, %v2599_v25 }
 0x88d   :  { %v2897_v7 = vmul.f32 -1.442695, %v2617_v15  ;;  %v2898_v8 = vmul.f32 -1.442695, %v2618_v3 }
 0x88e   :  { %3386 = vpow2.f32 %v2895_v28 }
 0x88f   :  { %3388 = vpow2.f32 %v2896_v45 }
 0x898   :  { %v3387_v35 = vpop.eup %3386 }
 0x899   :  { %v3389_v4 = vpop.eup %3388  ;;  %v2606_v5 = vadd.f32 1.0, %v3387_v35 }
 0x89a   :  { %v2607_v6 = vadd.f32 1.0, %v3389_v4 }
 0x89b   :  { %3390 = vrcp.f32 %v2606_v5 }
 0x89c   :  { %3392 = vrcp.f32 %v2607_v6 }
 0x89d   :  { %3394 = vpow2.f32 %v2897_v7 }
 0x89e   :  { %3396 = vpow2.f32 %v2898_v8 }
 0x8a5   :  { %v3391_v17 = vpop.eup %3390 }
 0x8a6   :  { %v3393_v22 = vpop.eup %3392  ;;  %v2637_v12 = vmul.f32 %v3391_v17, %v2633_v16 }
 0x8a7   :  { %v2638_v14 = vmul.f32 %v3393_v22, %v2634_v21  ;;  %v3395_v46 = vpop.eup %3394 }
 0x8a8   :  { %v2639_v42 = vadd.f32 %v2637_v12, %v2337_v29  ;;  %v3397_v49 = vpop.eup %3396  ;;  %v2625_v52 = vadd.f32 1.0, %v3395_v46 }
 0x8a9   :  { %v2640_v34 = vadd.f32 %v2638_v14, %v2340_v19  ;;  %v2626_v55 = vadd.f32 1.0, %v3397_v49 }
 0x8aa   :  { %3398 = vtanh.f32 %v2639_v42 }
 0x8ab   :  { %3400 = vtanh.f32 %v2640_v34 }
 0x8ac   :  { %3402 = vrcp.f32 %v2625_v52 }
 0x8ad   :  { %3404 = vrcp.f32 %v2626_v55 }
 0x8b4   :  { %v3399_v57 = vpop.eup %3398 }
 0x8b5   :  { %v3401_v2 = vpop.eup %3400  ;;  %v2645_v38 = vrot.slane %v3399_v57, 1 }
 0x8b6   :  { %v2646_v40 = vrot.slane %v3401_v2, 1  ;;  %v3403_v36 = vpop.eup %3402 }
 0x8b7   :  { %v2649_v41 = vsub.f32 %v4220_v23, %v2645_v38  ;;  %v3405_v50 = vpop.eup %3404 }
 0x8b8   :  { %v2650_v43 = vsub.f32 %v4222_v48, %v2646_v40 }
 0x8b9   :  { %v2653_v44 = vrot.slane %v2649_v41, 7 }
 0x8ba   :  { %v2654_v39 = vrot.slane %v2650_v43, 7 }
 0x8bb   :  { %v2657_v51 = vmul.f32 %v3403_v36, %v2653_v44 }
 0x8bc   :  { %v2658_v53 = vmul.f32 %v3405_v50, %v2654_v39 }
 0x8bd   :  { %v2659_v54 = vadd.f32 %v3399_v57, %v2657_v51 }
 0x8be   :  { %v2660_v56 = vadd.f32 %v3401_v2, %v2658_v53 }
 0x8bf   :  { %2661 = vst [vmem:[%s4261_s3] sm:$0x80] %v2659_v54  ;;  %2668 = vst [vmem:[#allocation2 - $0x7] sm:$0x80] %v2659_v54 }
 0x8c0   :  { %2662 = vst [vmem:[%s4261_s3 + $0x8] sm:$0x80] %v2660_v56  ;;  %v2665_v23 = vrot.slane %v2660_v56, 7 }
 0x8c2   :  { %2669 = vst [vmem:[#allocation2 + $0x1] sm:$0x1] %v2665_v23 }

</bundles_post_ra>
